<compile_context>
chip_gen: v7x
topology: tpu7x:2x2x1
jax: 0.10.0
libtpu: 0.0.40
codegen_flags: <defaults>
</compile_context>

<pallas_src>
import jax
import jax.numpy as jnp
from jax.experimental import pallas as pl
from jax.experimental.pallas import tpu as pltpu

# ------------------------- problem sizes (small) -------------------------
BATCH = 2
SEQ = 8
MODEL_DIM = 64
FFN_DIM = 64
NUM_HEADS = 8
HEAD_DIM = MODEL_DIM // NUM_HEADS
LN_EPS = 1e-5
LEAKY_SLOPE = 0.01


def _layernorm(y, gamma, beta):
    # One-pass LN (var = E[y^2] - mean^2) -> shorter reduce dependency chain.
    mean = jnp.mean(y, axis=-1, keepdims=True)
    meansq = jnp.mean(y * y, axis=-1, keepdims=True)
    var = meansq - mean * mean
    return (y - mean) * jax.lax.rsqrt(var + LN_EPS) * gamma + beta


def transformer_block_kernel(x_ref, wqkv_ref, wrest_ref, vec_ref, o_ref):
    B, S, H, Dh, D, F = BATCH, SEQ, NUM_HEADS, HEAD_DIM, MODEL_DIM, FFN_DIM
    bf16 = jnp.bfloat16

    x = x_ref[...]                                    # (B*S, D) f32
    vec = vec_ref[...]                                # (8, 3D) f32 bias/LN slab
    bqkv  = vec[0:1, :]                               # (1, 3D); q part pre-scaled
    bo    = vec[1:2, 0:D]
    ln1_g = vec[2:3, 0:D]
    ln1_b = vec[3:4, 0:D]
    b1    = vec[4:5, 0:F]
    b2    = vec[5:6, 0:D]
    ln2_g = vec[6:7, 0:D]
    ln2_b = vec[7:8, 0:D]

    # ---- fused QKV in-projection: one lane-dense GEMM (B*S,D)@(D,3D) ----
    qkv = jnp.dot(x.astype(bf16), wqkv_ref[...],
                  preferred_element_type=jnp.float32) + bqkv        # (B*S, 3D) f32
    qkv_b = qkv.astype(bf16)                                        # single lane-dense cast

    def to_heads(t):                                  # (B*S, D) -> (B*H, S, Dh)
        return t.reshape(B, S, H, Dh).transpose(0, 2, 1, 3).reshape(B * H, S, Dh)

    qh = to_heads(qkv_b[:, 0:D])
    kh = to_heads(qkv_b[:, D:2 * D])
    vh = to_heads(qkv_b[:, 2 * D:3 * D])

    # ---- per-(batch, head) attention; softmax in f32, exact normalization ----
    scores = jnp.einsum('bqd,bkd->bqk', qh, kh,
                        preferred_element_type=jnp.float32)         # (B*H, S, S)
    scores = scores - jnp.max(scores, axis=-1, keepdims=True)
    probs = jnp.exp(scores)
    probs = probs / jnp.sum(probs, axis=-1, keepdims=True)          # exact divide (S=8)
    ctx = jnp.einsum('bqk,bkd->bqd', probs.astype(bf16), vh,
                     preferred_element_type=jnp.float32)            # (B*H, S, Dh)

    # ---- back to lane-dense tokens, single output-projection GEMM ----
    ctx_flat = ctx.reshape(B, H, S, Dh).transpose(0, 2, 1, 3).reshape(B * S, D)
    attn = jnp.dot(ctx_flat.astype(bf16), wrest_ref[0:D, :],
                   preferred_element_type=jnp.float32) + bo         # (B*S, D) f32

    # ---- residual + LayerNorm1 (dropout == 0.0) ----
    s1 = _layernorm(attn + x, ln1_g, ln1_b)

    # ---- FFN: Linear -> LeakyReLU -> Linear (bf16 GEMMs, f32 accumulate) ----
    h1 = jnp.dot(s1.astype(bf16), wrest_ref[D:2 * D, :],
                 preferred_element_type=jnp.float32) + b1
    h1 = jnp.maximum(h1, LEAKY_SLOPE * h1)                          # LeakyReLU(0.01)
    h2 = jnp.dot(h1.astype(bf16), wrest_ref[2 * D:2 * D + F, :],
                 preferred_element_type=jnp.float32) + b2

    # ---- residual + LayerNorm2, direct (B*S, D) store ----
    o_ref[...] = _layernorm(h2 + s1, ln2_g, ln2_b).astype(o_ref.dtype)


def pack_params(params):
    """One-time wrapper-side packing (hoisted out of the per-call path)."""
    D, F, Dh = MODEL_DIM, FFN_DIM, HEAD_DIM
    assert F == D, "weight-slab packing assumes ffn_dim == model_dim"
    scale = 1.0 / (Dh ** 0.5)
    bf16 = jnp.bfloat16

    # Fused in-projection weight; 1/sqrt(Dh) folded into the q columns / bias.
    wqkv = jnp.concatenate([params["wq"] * scale, params["wk"], params["wv"]],
                           axis=1).astype(bf16)                      # (D, 3D)
    # Wo | W1 | W2 stacked along rows (64-row, sublane-tile aligned blocks).
    wrest = jnp.concatenate([params["wo"], params["w1"], params["w2"]],
                            axis=0).astype(bf16)                     # (3D, D)

    width = 3 * D

    def row(v):
        v = jnp.asarray(v, jnp.float32).reshape(1, -1)
        return jnp.pad(v, ((0, 0), (0, width - v.shape[1])))

    bqkv = jnp.concatenate([params["bq"] * scale, params["bk"], params["bv"]],
                           axis=1)                                   # (1, 3D)
    vecs = jnp.concatenate(
        [bqkv, row(params["bo"]), row(params["ln1_g"]), row(params["ln1_b"]),
         row(params["b1"]), row(params["b2"]), row(params["ln2_g"]),
         row(params["ln2_b"])], axis=0).astype(jnp.float32)          # (8, 3D)
    return {"wqkv": wqkv, "wrest": wrest, "vecs": vecs}


@jax.jit
def transformer_block(x, packed):
    B, S, D = x.shape
    x2 = x.reshape(B * S, D)                      # fold batch into rows

    full = lambda shape: pl.BlockSpec(shape, lambda i: (0, 0))
    grid_spec = pltpu.PrefetchScalarGridSpec(
        num_scalar_prefetch=0,
        grid=(1,),                                # single fused step (tiny problem)
        in_specs=[
            full((B * S, D)),                     # x
            full(packed["wqkv"].shape),           # bf16 (D, 3D)
            full(packed["wrest"].shape),          # bf16 (3D, D) = Wo|W1|W2
            full(packed["vecs"].shape),           # f32 (8, 3D) biases + LN params
        ],
        out_specs=full((B * S, D)),
    )
    out = pl.pallas_call(
        transformer_block_kernel,
        out_shape=jax.ShapeDtypeStruct((B * S, D), x.dtype),
        grid_spec=grid_spec,
        compiler_params=pltpu.CompilerParams(dimension_semantics=("arbitrary",)),
    )(x2, packed["wqkv"], packed["wrest"], packed["vecs"])
    return out.reshape(B, S, D)


# -------------------- pure-JAX (f32) reference for validation --------------------
def transformer_block_ref(x, p):
    B, S, D = x.shape
    q = x @ p["wq"] + p["bq"]
    k = x @ p["wk"] + p["bk"]
    v = x @ p["wv"] + p["bv"]
    qh = q.reshape(B, S, NUM_HEADS, HEAD_DIM).transpose(0, 2, 1, 3)
    kh = k.reshape(B, S, NUM_HEADS, HEAD_DIM).transpose(0, 2, 1, 3)
    vh = v.reshape(B, S, NUM_HEADS, HEAD_DIM).transpose(0, 2, 1, 3)
    s = jnp.einsum("bhqd,bhkd->bhqk", qh, kh) / (HEAD_DIM ** 0.5)
    pattn = jax.nn.softmax(s, axis=-1)
    o = jnp.einsum("bhqk,bhkd->bhqd", pattn, vh)
    o = o.transpose(0, 2, 1, 3).reshape(B, S, D)
    attn = o @ p["wo"] + p["bo"]

    def ln(y, g, b):
        m = jnp.mean(y, -1, keepdims=True)
        var = jnp.mean((y - m) ** 2, -1, keepdims=True)
        return (y - m) / jnp.sqrt(var + LN_EPS) * g + b

    s1 = ln(attn + x, p["ln1_g"], p["ln1_b"])
    h1 = s1 @ p["w1"] + p["b1"]
    h1 = jnp.where(h1 >= 0, h1, LEAKY_SLOPE * h1)
    h2 = h1 @ p["w2"] + p["b2"]
    return ln(h2 + s1, p["ln2_g"], p["ln2_b"])


def init_params(key, D, F):
    ks = jax.random.split(key, 12)
    n = lambda k, shape, s=0.05: (jax.random.normal(k, shape, jnp.float32) * s)
    return {
        "wq": n(ks[0], (D, D)), "wk": n(ks[1], (D, D)), "wv": n(ks[2], (D, D)),
        "bq": n(ks[3], (1, D)), "bk": n(ks[4], (1, D)), "bv": n(ks[5], (1, D)),
        "wo": n(ks[6], (D, D)), "bo": n(ks[7], (1, D)),
        "ln1_g": jnp.ones((1, D), jnp.float32), "ln1_b": jnp.zeros((1, D), jnp.float32),
        "w1": n(ks[8], (D, F)), "b1": n(ks[9], (1, F)),
        "w2": n(ks[10], (F, D)), "b2": n(ks[11], (1, D)),
        "ln2_g": jnp.ones((1, D), jnp.float32), "ln2_b": jnp.zeros((1, D), jnp.float32),
    }


if __name__ == "__main__":
    key = jax.random.PRNGKey(0)
    kx, kp = jax.random.split(key)
    x = jax.random.normal(kx, (BATCH, SEQ, MODEL_DIM), jnp.float32)
    params = init_params(kp, MODEL_DIM, FFN_DIM)

    # One-time packing (cast / concat / scale-fold), then the kernel call.
    packed = pack_params(params)
    packed = jax.tree_util.tree_map(jax.block_until_ready, packed)

    out = jax.block_until_ready(transformer_block(x, packed))
    ref = jax.block_until_ready(transformer_block_ref(x, params))

    max_err = float(jnp.max(jnp.abs(out - ref)))
    assert out.shape == (BATCH, SEQ, MODEL_DIM)
    # Softmax normalization is now exact; remaining error is bf16 MXU operands
    # (weights cast once wrapper-side) with f32 accumulation + f32 LN/softmax.
    assert max_err < 2e-2, f"mismatch vs reference: {max_err}"

    print("KERNEL_OK")
</pallas_src>

<mosaic_0001>
module attributes {stable_mosaic.version = 11 : i64} {
  func.func @transformer_block_kernel(%arg0: i32, %arg1: memref<16x64xf32, #tpu.memory_space<vmem>>, %arg2: memref<64x192xbf16, #tpu.memory_space<vmem>>, %arg3: memref<192x64xbf16, #tpu.memory_space<vmem>>, %arg4: memref<8x192xf32, #tpu.memory_space<vmem>>, %arg5: memref<16x64xf32, #tpu.memory_space<vmem>>) attributes {dimension_semantics = [#tpu.dimension_semantics<arbitrary>], iteration_bounds = array<i64: 1>, scalar_prefetch = 0 : i64, scratch_operands = 0 : i64, tpu.core_type = #tpu.core_type<tc>, window_params = [{pipeline_mode = #tpu.pipeline_mode<synchronous>, transform_indices = @transform_0, window_bounds = array<i64: 16, 64>}, {pipeline_mode = #tpu.pipeline_mode<synchronous>, transform_indices = @transform_1, window_bounds = array<i64: 64, 192>}, {pipeline_mode = #tpu.pipeline_mode<synchronous>, transform_indices = @transform_2, window_bounds = array<i64: 192, 64>}, {pipeline_mode = #tpu.pipeline_mode<synchronous>, transform_indices = @transform_3, window_bounds = array<i64: 8, 192>}, {pipeline_mode = #tpu.pipeline_mode<synchronous>, transform_indices = @transform_4, window_bounds = array<i64: 16, 64>}]} {
    %c0 = arith.constant 0 : index
    %c0_0 = arith.constant 0 : index
    %0 = vector.load %arg1[%c0, %c0_0] : memref<16x64xf32, #tpu.memory_space<vmem>>, vector<16x64xf32>
    %c0_1 = arith.constant 0 : index
    %c0_2 = arith.constant 0 : index
    %1 = vector.load %arg4[%c0_1, %c0_2] : memref<8x192xf32, #tpu.memory_space<vmem>>, vector<8x192xf32>
    %2 = vector.extract_strided_slice %1 {offsets = [0, 0], sizes = [1, 192], strides = [1, 1]} : vector<8x192xf32> to vector<1x192xf32>
    %3 = vector.extract_strided_slice %1 {offsets = [1, 0], sizes = [1, 64], strides = [1, 1]} : vector<8x192xf32> to vector<1x64xf32>
    %4 = vector.extract_strided_slice %1 {offsets = [2, 0], sizes = [1, 64], strides = [1, 1]} : vector<8x192xf32> to vector<1x64xf32>
    %5 = vector.extract_strided_slice %1 {offsets = [3, 0], sizes = [1, 64], strides = [1, 1]} : vector<8x192xf32> to vector<1x64xf32>
    %6 = vector.extract_strided_slice %1 {offsets = [4, 0], sizes = [1, 64], strides = [1, 1]} : vector<8x192xf32> to vector<1x64xf32>
    %7 = vector.extract_strided_slice %1 {offsets = [5, 0], sizes = [1, 64], strides = [1, 1]} : vector<8x192xf32> to vector<1x64xf32>
    %8 = vector.extract_strided_slice %1 {offsets = [6, 0], sizes = [1, 64], strides = [1, 1]} : vector<8x192xf32> to vector<1x64xf32>
    %9 = vector.extract_strided_slice %1 {offsets = [7, 0], sizes = [1, 64], strides = [1, 1]} : vector<8x192xf32> to vector<1x64xf32>
    %10 = arith.truncf %0 : vector<16x64xf32> to vector<16x64xbf16>
    %c0_3 = arith.constant 0 : index
    %c0_4 = arith.constant 0 : index
    %11 = vector.load %arg2[%c0_3, %c0_4] : memref<64x192xbf16, #tpu.memory_space<vmem>>, vector<64x192xbf16>
    %cst = arith.constant dense<0.000000e+00> : vector<16x192xf32>
    %12 = tpu.matmul %10, %11, %cst {dimension_numbers = #tpu.dot_dimension_numbers<[1], [0], [0], [1], [0, 0, 1, 1], [], []>} : vector<16x64xbf16>, vector<64x192xbf16>, vector<16x192xf32> -> vector<16x192xf32>
    %13 = vector.broadcast %2 : vector<1x192xf32> to vector<16x192xf32>
    %14 = arith.addf %12, %13 : vector<16x192xf32>
    %15 = arith.truncf %14 : vector<16x192xf32> to vector<16x192xbf16>
    %16 = vector.extract_strided_slice %15 {offsets = [0, 0], sizes = [16, 64], strides = [1, 1]} : vector<16x192xbf16> to vector<16x64xbf16>
    %17 = vector.shape_cast %16 : vector<16x64xbf16> to vector<2x8x8x8xbf16>
    %18 = tpu.transpose %17, [0, 2, 1, 3] : vector<2x8x8x8xbf16> -> vector<2x8x8x8xbf16>
    %19 = vector.shape_cast %18 : vector<2x8x8x8xbf16> to vector<16x8x8xbf16>
    %20 = vector.extract_strided_slice %15 {offsets = [0, 64], sizes = [16, 64], strides = [1, 1]} : vector<16x192xbf16> to vector<16x64xbf16>
    %21 = vector.shape_cast %20 : vector<16x64xbf16> to vector<2x8x8x8xbf16>
    %22 = tpu.transpose %21, [0, 2, 1, 3] : vector<2x8x8x8xbf16> -> vector<2x8x8x8xbf16>
    %23 = vector.shape_cast %22 : vector<2x8x8x8xbf16> to vector<16x8x8xbf16>
    %24 = vector.extract_strided_slice %15 {offsets = [0, 128], sizes = [16, 64], strides = [1, 1]} : vector<16x192xbf16> to vector<16x64xbf16>
    %25 = vector.shape_cast %24 : vector<16x64xbf16> to vector<2x8x8x8xbf16>
    %26 = tpu.transpose %25, [0, 2, 1, 3] : vector<2x8x8x8xbf16> -> vector<2x8x8x8xbf16>
    %27 = vector.shape_cast %26 : vector<2x8x8x8xbf16> to vector<16x8x8xbf16>
    "tpu.trace_start"() <{level = 10 : i32, message = "bqd,bkd->bqk"}> : () -> ()
    %cst_5 = arith.constant dense<0.000000e+00> : vector<16x8x8xf32>
    %28 = tpu.matmul %19, %23, %cst_5 {dimension_numbers = #tpu.dot_dimension_numbers<[2], [2], [1], [1], [0, 0, 0, 1, 1, 1], [0], [0]>} : vector<16x8x8xbf16>, vector<16x8x8xbf16>, vector<16x8x8xf32> -> vector<16x8x8xf32>
    "tpu.trace_stop"() : () -> ()
    %cst_6 = arith.constant dense<0xFF800000> : vector<16x8xf32>
    %29 = vector.multi_reduction <maximumf>, %28, %cst_6 [2] : vector<16x8x8xf32> to vector<16x8xf32>
    %30 = vector.shape_cast %29 : vector<16x8xf32> to vector<16x8x1xf32>
    %31 = vector.broadcast %30 : vector<16x8x1xf32> to vector<16x8x8xf32>
    %32 = arith.subf %28, %31 : vector<16x8x8xf32>
    %33 = math.exp %32 : vector<16x8x8xf32>
    %cst_7 = arith.constant dense<0.000000e+00> : vector<16x8xf32>
    %34 = vector.multi_reduction <add>, %33, %cst_7 [2] : vector<16x8x8xf32> to vector<16x8xf32>
    %35 = vector.shape_cast %34 : vector<16x8xf32> to vector<16x8x1xf32>
    %36 = vector.broadcast %35 : vector<16x8x1xf32> to vector<16x8x8xf32>
    %37 = arith.divf %33, %36 : vector<16x8x8xf32>
    %38 = arith.truncf %37 : vector<16x8x8xf32> to vector<16x8x8xbf16>
    "tpu.trace_start"() <{level = 10 : i32, message = "bqk,bkd->bqd"}> : () -> ()
    %cst_8 = arith.constant dense<0.000000e+00> : vector<16x8x8xf32>
    %39 = tpu.matmul %38, %27, %cst_8 {dimension_numbers = #tpu.dot_dimension_numbers<[2], [1], [1], [2], [0, 0, 0, 1, 1, 2], [0], [0]>} : vector<16x8x8xbf16>, vector<16x8x8xbf16>, vector<16x8x8xf32> -> vector<16x8x8xf32>
    "tpu.trace_stop"() : () -> ()
    %40 = vector.shape_cast %39 : vector<16x8x8xf32> to vector<2x8x8x8xf32>
    %41 = tpu.transpose %40, [0, 2, 1, 3] : vector<2x8x8x8xf32> -> vector<2x8x8x8xf32>
    %42 = vector.shape_cast %41 : vector<2x8x8x8xf32> to vector<16x64xf32>
    %43 = arith.truncf %42 : vector<16x64xf32> to vector<16x64xbf16>
    %c0_9 = arith.constant 0 : index
    %c0_10 = arith.constant 0 : index
    %44 = vector.load %arg3[%c0_9, %c0_10] : memref<192x64xbf16, #tpu.memory_space<vmem>>, vector<64x64xbf16>
    %cst_11 = arith.constant dense<0.000000e+00> : vector<16x64xf32>
    %45 = tpu.matmul %43, %44, %cst_11 {dimension_numbers = #tpu.dot_dimension_numbers<[1], [0], [0], [1], [0, 0, 1, 1], [], []>} : vector<16x64xbf16>, vector<64x64xbf16>, vector<16x64xf32> -> vector<16x64xf32>
    %46 = vector.broadcast %3 : vector<1x64xf32> to vector<16x64xf32>
    %47 = arith.addf %45, %46 : vector<16x64xf32>
    %48 = arith.addf %47, %0 : vector<16x64xf32>
    %cst_12 = arith.constant dense<0.000000e+00> : vector<16xf32>
    %49 = vector.multi_reduction <add>, %48, %cst_12 [1] : vector<16x64xf32> to vector<16xf32>
    %50 = vector.shape_cast %49 : vector<16xf32> to vector<16x1xf32>
    %cst_13 = arith.constant 6.400000e+01 : f32
    %51 = vector.broadcast %cst_13 : f32 to vector<16x1xf32>
    %52 = arith.divf %50, %51 : vector<16x1xf32>
    %53 = arith.mulf %48, %48 : vector<16x64xf32>
    %cst_14 = arith.constant dense<0.000000e+00> : vector<16xf32>
    %54 = vector.multi_reduction <add>, %53, %cst_14 [1] : vector<16x64xf32> to vector<16xf32>
    %55 = vector.shape_cast %54 : vector<16xf32> to vector<16x1xf32>
    %cst_15 = arith.constant 6.400000e+01 : f32
    %56 = vector.broadcast %cst_15 : f32 to vector<16x1xf32>
    %57 = arith.divf %55, %56 : vector<16x1xf32>
    %58 = arith.mulf %52, %52 : vector<16x1xf32>
    %59 = arith.subf %57, %58 : vector<16x1xf32>
    %60 = vector.broadcast %52 : vector<16x1xf32> to vector<16x64xf32>
    %61 = arith.subf %48, %60 : vector<16x64xf32>
    %cst_16 = arith.constant 9.99999974E-6 : f32
    %62 = vector.broadcast %cst_16 : f32 to vector<16x1xf32>
    %63 = arith.addf %59, %62 : vector<16x1xf32>
    %64 = math.rsqrt %63 : vector<16x1xf32>
    %65 = vector.broadcast %64 : vector<16x1xf32> to vector<16x64xf32>
    %66 = arith.mulf %61, %65 : vector<16x64xf32>
    %67 = vector.broadcast %4 : vector<1x64xf32> to vector<16x64xf32>
    %68 = arith.mulf %66, %67 : vector<16x64xf32>
    %69 = vector.broadcast %5 : vector<1x64xf32> to vector<16x64xf32>
    %70 = arith.addf %68, %69 : vector<16x64xf32>
    %71 = arith.truncf %70 : vector<16x64xf32> to vector<16x64xbf16>
    %c64 = arith.constant 64 : index
    %c0_17 = arith.constant 0 : index
    %72 = vector.load %arg3[%c64, %c0_17] : memref<192x64xbf16, #tpu.memory_space<vmem>>, vector<64x64xbf16>
    %cst_18 = arith.constant dense<0.000000e+00> : vector<16x64xf32>
    %73 = tpu.matmul %71, %72, %cst_18 {dimension_numbers = #tpu.dot_dimension_numbers<[1], [0], [0], [1], [0, 0, 1, 1], [], []>} : vector<16x64xbf16>, vector<64x64xbf16>, vector<16x64xf32> -> vector<16x64xf32>
    %74 = vector.broadcast %6 : vector<1x64xf32> to vector<16x64xf32>
    %75 = arith.addf %73, %74 : vector<16x64xf32>
    %cst_19 = arith.constant 0.00999999977 : f32
    %76 = vector.broadcast %cst_19 : f32 to vector<16x64xf32>
    %77 = arith.mulf %76, %75 : vector<16x64xf32>
    %78 = arith.maximumf %75, %77 : vector<16x64xf32>
    %79 = arith.truncf %78 : vector<16x64xf32> to vector<16x64xbf16>
    %c128 = arith.constant 128 : index
    %c0_20 = arith.constant 0 : index
    %80 = vector.load %arg3[%c128, %c0_20] : memref<192x64xbf16, #tpu.memory_space<vmem>>, vector<64x64xbf16>
    %cst_21 = arith.constant dense<0.000000e+00> : vector<16x64xf32>
    %81 = tpu.matmul %79, %80, %cst_21 {dimension_numbers = #tpu.dot_dimension_numbers<[1], [0], [0], [1], [0, 0, 1, 1], [], []>} : vector<16x64xbf16>, vector<64x64xbf16>, vector<16x64xf32> -> vector<16x64xf32>
    %82 = vector.broadcast %7 : vector<1x64xf32> to vector<16x64xf32>
    %83 = arith.addf %81, %82 : vector<16x64xf32>
    %84 = arith.addf %83, %70 : vector<16x64xf32>
    %cst_22 = arith.constant dense<0.000000e+00> : vector<16xf32>
    %85 = vector.multi_reduction <add>, %84, %cst_22 [1] : vector<16x64xf32> to vector<16xf32>
    %86 = vector.shape_cast %85 : vector<16xf32> to vector<16x1xf32>
    %cst_23 = arith.constant 6.400000e+01 : f32
    %87 = vector.broadcast %cst_23 : f32 to vector<16x1xf32>
    %88 = arith.divf %86, %87 : vector<16x1xf32>
    %89 = arith.mulf %84, %84 : vector<16x64xf32>
    %cst_24 = arith.constant dense<0.000000e+00> : vector<16xf32>
    %90 = vector.multi_reduction <add>, %89, %cst_24 [1] : vector<16x64xf32> to vector<16xf32>
    %91 = vector.shape_cast %90 : vector<16xf32> to vector<16x1xf32>
    %cst_25 = arith.constant 6.400000e+01 : f32
    %92 = vector.broadcast %cst_25 : f32 to vector<16x1xf32>
    %93 = arith.divf %91, %92 : vector<16x1xf32>
    %94 = arith.mulf %88, %88 : vector<16x1xf32>
    %95 = arith.subf %93, %94 : vector<16x1xf32>
    %96 = vector.broadcast %88 : vector<16x1xf32> to vector<16x64xf32>
    %97 = arith.subf %84, %96 : vector<16x64xf32>
    %cst_26 = arith.constant 9.99999974E-6 : f32
    %98 = vector.broadcast %cst_26 : f32 to vector<16x1xf32>
    %99 = arith.addf %95, %98 : vector<16x1xf32>
    %100 = math.rsqrt %99 : vector<16x1xf32>
    %101 = vector.broadcast %100 : vector<16x1xf32> to vector<16x64xf32>
    %102 = arith.mulf %97, %101 : vector<16x64xf32>
    %103 = vector.broadcast %8 : vector<1x64xf32> to vector<16x64xf32>
    %104 = arith.mulf %102, %103 : vector<16x64xf32>
    %105 = vector.broadcast %9 : vector<1x64xf32> to vector<16x64xf32>
    %106 = arith.addf %104, %105 : vector<16x64xf32>
    %c0_27 = arith.constant 0 : index
    %c0_28 = arith.constant 0 : index
    %107 = vector.load %arg5[%c0_27, %c0_28] : memref<16x64xf32, #tpu.memory_space<vmem>>, vector<16x64xf32>
    tpu.vector_store %arg5[%c0_27, %c0_28], %106 {strides = array<i32>} : memref<16x64xf32, #tpu.memory_space<vmem>>, vector<16x64xf32>,
    return
  }
  func.func @transform_0(%arg0: i32) -> (i32, i32) {
    %c0_i32 = arith.constant 0 : i32
    %c0_i32_0 = arith.constant 0 : i32
    %c0_i32_1 = arith.constant 0 : i32
    return %c0_i32, %c0_i32_0 : i32, i32
  }
  func.func @transform_1(%arg0: i32) -> (i32, i32) {
    %c0_i32 = arith.constant 0 : i32
    %c0_i32_0 = arith.constant 0 : i32
    %c0_i32_1 = arith.constant 0 : i32
    return %c0_i32, %c0_i32_0 : i32, i32
  }
  func.func @transform_2(%arg0: i32) -> (i32, i32) {
    %c0_i32 = arith.constant 0 : i32
    %c0_i32_0 = arith.constant 0 : i32
    %c0_i32_1 = arith.constant 0 : i32
    return %c0_i32, %c0_i32_0 : i32, i32
  }
  func.func @transform_3(%arg0: i32) -> (i32, i32) {
    %c0_i32 = arith.constant 0 : i32
    %c0_i32_0 = arith.constant 0 : i32
    %c0_i32_1 = arith.constant 0 : i32
    return %c0_i32, %c0_i32_0 : i32, i32
  }
  func.func @transform_4(%arg0: i32) -> (i32, i32) {
    %c0_i32 = arith.constant 0 : i32
    %c0_i32_0 = arith.constant 0 : i32
    %c0_i32_1 = arith.constant 0 : i32
    return %c0_i32, %c0_i32_0 : i32, i32
  }
}

</mosaic_0001>

<bundles_post_ra>
// kernel: transformer_block.1
= control target key start
LH: loop header
LB: loop body
LE: loop exit
PB: predicated region body
PF: predicated region fallthrough
CT: control target
= control target key end

     0   :  { %v4442_v2 = vmov 0   ;;  %s5504_s0 = inlined_call_operand.vmem [shape: f32[16,64], index: 0, kind: input, shape index: {}]   ;;  %s5505_s1 = inlined_call_operand.vmem [shape: bf16[64,192], index: 1, kind: input, shape index: {}]   ;;  %s5506_s2 = inlined_call_operand.vmem [shape: bf16[192,64], index: 2, kind: input, shape index: {}]   ;;  %s5507_s3 = inlined_call_operand.vmem [shape: f32[8,192], index: 3, kind: input, shape index: {}]   ;;  %s5508_s4 = inlined_call_operand.hbm [shape: f32[16,64], index: 4, kind: output, shape index: {}]  }
   0x1   :  { %v4319_v0 = vld [vmem:[%s5505_s1 + $0x4] ss:$8 sps:$4 sm:$0xff]   ;;  %v4321_v1 = vld [vmem:[%s5505_s1] ss:$8 sps:$4 sm:$0xff]   ;;  %116 = vmatprep.mubr.bf16.mxu0 %v4442_v2  ;;  %v4322_v3 = vld [vmem:[%s5505_s1 + $0x14] ss:$8 sps:$4 sm:$0xff]  }
   0x2   :  { %84 = vmatprep.subr.bf16.mxu0 %v4319_v0  ;;  %v4324_v4 = vld [vmem:[%s5505_s1 + $0x10] ss:$8 sps:$4 sm:$0xff]   ;;  %v4325_v5 = vld [vmem:[%s5505_s1 + $0x24] ss:$8 sps:$4 sm:$0xff]   ;;  %v4327_v6 = vld [vmem:[%s5505_s1 + $0x20] ss:$8 sps:$4 sm:$0xff]  }
   0x3   :  { %85 = vmatpush1.bf16.msra.mxu0 %v4321_v1  ;;  %v4328_v7 = vld [vmem:[%s5505_s1 + $0x34] ss:$8 sps:$4 sm:$0xff]   ;;  %v4330_v8 = vld [vmem:[%s5505_s1 + $0x30] ss:$8 sps:$4 sm:$0xff]   ;;  %v19_v9 = vld [vmem:[%s5504_s0] sm:$0xff] }
   0x4   :  { %86 = vmatprep.subr.bf16.mxu0 %v4322_v3  ;;  %v20_v10 = vld [vmem:[%s5504_s0 + $0x8] sm:$0xff] }
   0x5   :  { %v23_v11 = vpack.c.bf16 %v20_v10, %v19_v9 }
   0x7   :  { %87 = vmatpush1.bf16.msra.mxu0 %v4324_v4 }
   0x8   :  { %88 = vmatprep.subr.bf16.mxu0 %v4325_v5 }
   0xb   :  { %89 = vmatpush1.bf16.msra.mxu0 %v4327_v6 }
   0xc   :  { %90 = vmatprep.subr.bf16.mxu0 %v4328_v7 }
   0xd   :  { %9 = vsyncpa [#allocation3], 0  ;;  %vm80_vm0 = vcmask 523264   ;;  %v32_v12 = vlaneseq  ;;  %v21_v15 = vld [vmem:[%s5507_s3] sm:$0xff]  ;;  %v22_v16 = vld [vmem:[%s5507_s3 + $0x8] sm:$0xff]  ;;  %s4443_s12 = smov 104  }
   0xe   :  { %s4444_s13 = smov 120   ;;  %s4445_s14 = smov 96   ;;  %v4451_v31 = vmov 1983009808   ;;  %v4452_v41 = vmov 1934713408  }
   0xf   :  { %91 = vmatpush1.bf16.msra.mxu0 %v4330_v8  ;;  %v4521_v13 = vshrl.u32 %v32_v12, 7  ;;  %s4446_s15 = smov 112   ;;  %s4447_s16 = smov 80   ;;  %v179_v32 = vunpack.c.l.s4 %v4451_v31  ;;  %v211_v42 = vunpack.c.l.s4 %v4452_v41  ;;  %v4453_v1 = vmov 0.0  }
  0x10   :  { %s4448_s17 = smov 88   ;;  %s4449_s18 = smov 64   ;;  %4034 = vmatprep.subr.bf16.mxu1 %v4453_v1  ;;  %4058 = vmatprep.subr.bf16.mxu0 %v4453_v1  ;;  %vm4454_vm1 = vmmov 0   ;;  %vm1231_vm2 = vcmask 64512   ;;  %vm2163_vm3 = vcmask 1043456   ;;  %vm3499_vm4 = vcmask 130048  }
  0x11   :  { %v34_v14 = vsub.s32 0, %v4521_v13  ;;  %s4450_s19 = smov 72   ;;  %v180_v40 = vunpack.c.0.s8 %v179_v32  ;;  %v212_v56 = vunpack.c.0.s8 %v211_v42  ;;  %4036 = vmatprep.mubr.msk.bf16.mxu1 %vm4454_vm1, %v4453_v1  ;;  %s4455_s24 = smov 16   ;;  %vm3502_vm5 = vcmask 195584  }
  0x12   :  { %3879 = vmatmul.mubr.msk.bf16.vlgmr.msra.gmra.mrb[0].mxu0 %vm80_vm0, %v23_v11  ;;  %s4456_s25 = smov 8   ;;  %s4457_s26 = smov 24   ;;  %vm3505_vm6 = vcmask 261120   ;;  %vm3508_vm7 = vcmask 326656   ;;  %vm3511_vm8 = vcmask 392192   ;;  %vm3514_vm9 = vcmask 457728  }
  0x13   :  { %v35_v17 = vrot.slane %v21_v15, %v34_v14  ;;  %v39_v19 = vrot.slane %v22_v16, %v34_v14  ;;  %v4546_v55 = vsub.s32 %v180_v40, %v4521_v13  ;;  %v4553_v3 = vsub.s32 %v212_v56, %v4521_v13  ;;  %4060 = vmatprep.mubr.msk.bf16.mxu0 %vm4454_vm1, %v4453_v1  ;;  %s4458_s5 = smov 40   ;;  %s4459_s6 = smov 32  }
  0x14   :  { %s4460_s7 = smov 56   ;;  %s4461_s8 = smov 48  }
  0xe5   :  { %v118_v18 = vpop.f32.mrb[0].mxu0 }
  0xe6   :  { %v120_v20 = vpop.f32.mrb[1].mxu0  ;;  %v119_v22 = vadd.f32 %v118_v18, %v35_v17 }
  0xe7   :  { %v122_v21 = vpop.f32.mrb[2].mxu0  ;;  %v121_v25 = vadd.f32 %v120_v20, %v39_v19 }
  0xe8   :  { %v123_v23 = vadd.f32 %v122_v21, %v35_v17  ;;  %v124_v24 = vpop.f32.mrb[3].mxu0 }
  0xe9   :  { %v125_v26 = vadd.f32 %v124_v24, %v39_v19 }
  0xea   :  { %v127_v27 = vpack.c.bf16 %v123_v23, %v119_v22 }
  0xeb   :  { %v4530_v28 = vpack.c.bf16 %v125_v26, %v121_v25 }
  0xec   :  { %134 = vrot.lane.b32.xlu1 %v127_v27, %s4443_s12  ;;  %130 = vrot.lane.b32.xlu0 %v127_v27, %s4444_s13  ;;  %v148_v43 = vshrl.u32 %v127_v27, 16 }
  0xf0   :  { %136 = vrot.lane.b32.xlu1 %v127_v27, %s4445_s14  ;;  %132 = vrot.lane.b32.xlu0 %v127_v27, %s4446_s15 }
  0xf4   :  { %140 = vrot.lane.b32.xlu1 %v127_v27, %s4447_s16  ;;  %138 = vrot.lane.b32.xlu0 %v127_v27, %s4448_s17 }
  0xf8   :  { %496 = vrot.lane.b32.xlu1 %v127_v27, %s4449_s18  ;;  %142 = vrot.lane.b32.xlu0 %v127_v27, %s4450_s19 }
 0x15e   :  { %v135_v29 = vpop.permute.xlu1 %134  ;;  %v131_v30 = vpop.permute.xlu0 %130 }
 0x15f   :  { %498 = vrot.lane.b32.xlu0 %v131_v30, %s4449_s18  ;;  %v157_v34 = vshrl.u32 %v135_v29, 16  ;;  %v149_v38 = vshrl.u32 %v131_v30, 16  ;;  %v146_v45 = vpack.i.b16 %v131_v30, %v127_v27 }
 0x161   :  { %v150_v49 = vpack.i.b16 %v149_v38, %v148_v43 }
 0x162   :  { %v133_v33 = vpop.permute.xlu0 %132  ;;  %v137_v35 = vpop.permute.xlu1 %136 }
 0x163   :  { %v154_v36 = vpack.i.b16 %v135_v29, %v133_v33  ;;  %v156_v37 = vshrl.u32 %v133_v33, 16  ;;  %502 = vrot.lane.b32.xlu0 %v135_v29, %s4449_s18  ;;  %500 = vrot.lane.b32.xlu1 %v133_v33, %s4449_s18  ;;  %v164_v46 = vshrl.u32 %v137_v35, 16 }
 0x165   :  { %v158_v39 = vpack.i.b16 %v157_v34, %v156_v37 }
 0x166   :  { %v139_v44 = vpop.permute.xlu0 %138  ;;  %v141_v50 = vpop.permute.xlu1 %140 }
 0x167   :  { %v162_v47 = vpack.i.b16 %v139_v44, %v137_v35  ;;  %v165_v48 = vshrl.u32 %v139_v44, 16  ;;  %504 = vrot.lane.b32.xlu1 %v137_v35, %s4449_s18  ;;  %506 = vrot.lane.b32.xlu0 %v139_v44, %s4449_s18  ;;  %v172_v59 = vshrl.u32 %v141_v50, 16 }
 0x169   :  { %v166_v51 = vpack.i.b16 %v165_v48, %v164_v46  ;;  %v176_v52 = vcombine.low %v146_v45, %v162_v47  ;;  %v177_v53 = vcombine.high %v146_v45, %v162_v47 }
 0x16a   :  { %v143_v54 = vpop.permute.xlu0 %142 }
 0x16b   :  { %v244_v57 = vcombine.low %v150_v49, %v166_v51  ;;  %v245_v58 = vcombine.high %v150_v49, %v166_v51  ;;  %508 = vrot.lane.b32.xlu1 %v141_v50, %s4449_s18  ;;  %v170_v60 = vpack.i.b16 %v143_v54, %v141_v50  ;;  %v173_v61 = vshrl.u32 %v143_v54, 16  ;;  %510 = vrot.lane.b32.xlu0 %v143_v54, %s4449_s18 }
 0x16c   :  { %v184_v4 = vrot.slane %v176_v52, %v4546_v55  ;;  %v191_v5 = vrot.slane %v177_v53, %v4546_v55 }
 0x16d   :  { %v174_v62 = vpack.i.b16 %v173_v61, %v172_v59  ;;  %v192_v63 = vcombine.low %v154_v36, %v170_v60  ;;  %v193_v0 = vcombine.high %v154_v36, %v170_v60  ;;  %v252_v15 = vrot.slane %v244_v57, %v4546_v55 }
 0x16e   :  { %v259_v16 = vrot.slane %v245_v58, %v4546_v55 }
 0x16f   :  { %867 = vrot.lane.b32.xlu1 %v4530_v28, %s4446_s15  ;;  %v200_v6 = vrot.slane %v192_v63, %v4546_v55  ;;  %v207_v7 = vrot.slane %v193_v0, %v4546_v55  ;;  %v260_v8 = vcombine.low %v158_v39, %v174_v62  ;;  %v261_v9 = vcombine.high %v158_v39, %v174_v62 }
 0x170   :  { %865 = vrot.lane.b32.xlu0 %v4530_v28, %s4444_s13 }
 0x171   :  { %v208_v10 = vcombine.low %v184_v4, %v200_v6  ;;  %v209_v11 = vcombine.high %v184_v4, %v200_v6  ;;  %v224_v12 = vcombine.low %v191_v5, %v207_v7  ;;  %v225_v14 = vcombine.high %v191_v5, %v207_v7 }
 0x172   :  { %v268_v17 = vrot.slane %v260_v8, %v4546_v55  ;;  %v275_v18 = vrot.slane %v261_v9, %v4546_v55 }
 0x173   :  { %869 = vrot.lane.b32.xlu1 %v4530_v28, %s4443_s12  ;;  %v216_v19 = vrot.slane %v208_v10, %v4553_v3  ;;  %v223_v20 = vrot.slane %v209_v11, %v4553_v3  ;;  %v232_v21 = vrot.slane %v224_v12, %v4553_v3  ;;  %v239_v22 = vrot.slane %v225_v14, %v4553_v3 }
 0x174   :  { %v276_v23 = vcombine.low %v252_v15, %v268_v17  ;;  %v277_v24 = vcombine.high %v252_v15, %v268_v17  ;;  %v292_v25 = vcombine.low %v259_v16, %v275_v18  ;;  %v293_v26 = vcombine.high %v259_v16, %v275_v18 }
 0x175   :  { %v312_v27 = vcombine.low %v216_v19, %v223_v20  ;;  %v3880_v29 = vcombine.high %v216_v19, %v223_v20  ;;  %v380_v30 = vcombine.low %v232_v21, %v239_v22  ;;  %v3882_v31 = vcombine.high %v232_v21, %v239_v22 }
 0x176   :  { %v284_v32 = vrot.slane %v276_v23, %v4553_v3  ;;  %v291_v33 = vrot.slane %v277_v24, %v4553_v3  ;;  %v300_v34 = vrot.slane %v292_v25, %v4553_v3  ;;  %v307_v35 = vrot.slane %v293_v26, %v4553_v3 }
 0x177   :  { %v319_v36 = vrot.slane %v312_v27, %v4546_v55  ;;  %v327_v37 = vrot.slane %v3880_v29, %v4546_v55  ;;  %v387_v38 = vrot.slane %v380_v30, %v4546_v55  ;;  %v395_v39 = vrot.slane %v3882_v31, %v4546_v55 }
 0x178   :  { %v346_v40 = vcombine.low %v284_v32, %v291_v33  ;;  %v3881_v41 = vcombine.high %v284_v32, %v291_v33  ;;  %v414_v42 = vcombine.low %v300_v34, %v307_v35  ;;  %v3883_v43 = vcombine.high %v300_v34, %v307_v35 }
 0x179   :  { %v329_v44 = vcombine.high %v319_v36, %v327_v37  ;;  %v396_v45 = vcombine.low %v387_v38, %v395_v39  ;;  %v397_v46 = vcombine.high %v387_v38, %v395_v39  ;;  %v328_v49 = vcombine.low %v319_v36, %v327_v37 }
 0x17a   :  { %v421_v47 = vrot.slane %v414_v42, %v4546_v55  ;;  %v429_v48 = vrot.slane %v3883_v43, %v4546_v55  ;;  %v353_v50 = vrot.slane %v346_v40, %v4546_v55  ;;  %v361_v51 = vrot.slane %v3881_v41, %v4546_v55 }
 0x17b   :  { %v4590_v52 = vrot.slane %v329_v44, %v4553_v3  ;;  %v4593_v53 = vrot.slane %v328_v49, %v4553_v3  ;;  %v4596_v54 = vrot.slane %v396_v45, %v4553_v3  ;;  %v4599_v57 = vrot.slane %v397_v46, %v4553_v3  ;;  %v497_v46 = vpop.permute.xlu1 %496 }
 0x17c   :  { %v430_v56 = vcombine.low %v421_v47, %v429_v48  ;;  %v362_v58 = vcombine.low %v353_v50, %v361_v51  ;;  %v363_v59 = vcombine.high %v353_v50, %v361_v51  ;;  %v431_v7 = vcombine.high %v421_v47, %v429_v48 }
 0x17d   :  { %v4603_v60 = vcombine.high %v4590_v52, %v4442_v2  ;;  %v463_v61 = vshrl.u32 %v4590_v52, 16  ;;  %v451_v62 = vshrl.u32 %v4593_v53, 16  ;;  %v4609_v63 = vcombine.high %v4593_v53, %v4442_v2 }
 0x17e   :  { %v4612_v0 = vrot.slane %v430_v56, %v4553_v3  ;;  %v4616_v4 = vcombine.high %v4596_v54, %v4442_v2  ;;  %v4619_v5 = vrot.slane %v362_v58, %v4553_v3  ;;  %v4622_v6 = vrot.slane %v363_v59, %v4553_v3 }
 0x17f   :  { %v469_v8 = vshrl.u32 %v4603_v60, 16  ;;  %v457_v10 = vshrl.u32 %v4609_v63, 16  ;;  %v4634_v12 = vcombine.high %v4599_v57, %v4442_v2  ;;  %v4653_v21 = vrot.slane %v431_v7, %v4553_v3 }
 0x180   :  { %v474_v9 = vpack.i.b16 %v4612_v0, %v4596_v54  ;;  %v4630_v11 = vcombine.high %v4612_v0, %v4442_v2  ;;  %v450_v14 = vpack.i.b16 %v4619_v5, %v4593_v53  ;;  %v462_v15 = vpack.i.b16 %v4622_v6, %v4590_v52 }
 0x181   :  { %v452_v16 = vshrl.u32 %v4619_v5, 16  ;;  %v4643_v17 = vcombine.high %v4622_v6, %v4442_v2  ;;  %v4647_v18 = vcombine.high %v4619_v5, %v4442_v2  ;;  %v464_v20 = vshrl.u32 %v4622_v6, 16 }
 0x182   :  { %v475_v25 = vshrl.u32 %v4596_v54, 16  ;;  %v4672_v32 = vcombine.high %v4653_v21, %v4442_v2  ;;  %v476_v33 = vshrl.u32 %v4612_v0, 16  ;;  %v481_v34 = vshrl.u32 %v4616_v4, 16 }
 0x183   :  { %v4655_v22 = vpack.i.b16 %v452_v16, %v451_v62  ;;  %v468_v23 = vpack.i.b16 %v4643_v17, %v4603_v60  ;;  %v470_v24 = vshrl.u32 %v4643_v17, 16  ;;  %v456_v26 = vpack.i.b16 %v4647_v18, %v4609_v63 }
 0x184   :  { %v458_v27 = vshrl.u32 %v4647_v18, 16  ;;  %v4664_v29 = vpack.i.b16 %v464_v20, %v463_v61  ;;  %v482_v36 = vshrl.u32 %v4630_v11, 16  ;;  %v487_v37 = vshrl.u32 %v4599_v57, 16 }
 0x185   :  { %v4668_v31 = vpack.i.b16 %v470_v24, %v469_v8  ;;  %v488_v38 = vshrl.u32 %v4653_v21, 16  ;;  %v4683_v40 = vpack.i.b16 %v476_v33, %v475_v25  ;;  %v493_v41 = vshrl.u32 %v4634_v12, 16 }
 0x186   :  { %v4676_v35 = vpack.i.b16 %v458_v27, %v457_v10  ;;  %v494_v42 = vshrl.u32 %v4672_v32, 16  ;;  %v4687_v43 = vpack.i.b16 %v482_v36, %v481_v34  ;;  %v516_v16 = vshrl.u32 %v497_v46, 16 }
 0x187   :  { %v4689_v44 = vpack.i.b16 %v488_v38, %v487_v37  ;;  %v5509_v18 = vpack.i.b16 %v4630_v11, %v4616_v4 }
 0x188   :  { %v4691_v45 = vpack.i.b16 %v494_v42, %v493_v41 }
 0x1d1   :  { %v499_v47 = vpop.permute.xlu0 %498 }
 0x1d2   :  { %v517_v61 = vshrl.u32 %v499_v47, 16  ;;  %v514_v62 = vpack.i.b16 %v499_v47, %v497_v46 }
 0x1d4   :  { %v518_v37 = vpack.i.b16 %v517_v61, %v516_v16 }
 0x1d5   :  { %v501_v48 = vpop.permute.xlu1 %500  ;;  %v503_v49 = vpop.permute.xlu0 %502 }
 0x1d6   :  { %v524_v7 = vshrl.u32 %v501_v48, 16  ;;  %v525_v8 = vshrl.u32 %v503_v49, 16  ;;  %v522_v20 = vpack.i.b16 %v503_v49, %v501_v48 }
 0x1d8   :  { %v526_v38 = vpack.i.b16 %v525_v8, %v524_v7 }
 0x1d9   :  { %v505_v50 = vpop.permute.xlu1 %504  ;;  %v507_v51 = vpop.permute.xlu0 %506 }
 0x1da   :  { %v532_v56 = vshrl.u32 %v505_v50, 16  ;;  %v533_v58 = vshrl.u32 %v507_v51, 16  ;;  %v530_v59 = vpack.i.b16 %v507_v51, %v505_v50 }
 0x1dc   :  { %v534_v24 = vpack.i.b16 %v533_v58, %v532_v56  ;;  %v544_v27 = vcombine.low %v514_v62, %v530_v59  ;;  %v545_v7 = vcombine.high %v514_v62, %v530_v59 }
 0x1dd   :  { %v509_v10 = vpop.permute.xlu1 %508  ;;  %v511_v25 = vpop.permute.xlu0 %510 }
 0x1de   :  { %v540_v33 = vshrl.u32 %v509_v10, 16  ;;  %v538_v34 = vpack.i.b16 %v511_v25, %v509_v10  ;;  %v541_v36 = vshrl.u32 %v511_v25, 16  ;;  %v612_v39 = vcombine.low %v518_v37, %v534_v24 }
 0x1df   :  { %v552_v50 = vrot.slane %v544_v27, %v4546_v55  ;;  %v613_v19 = vcombine.high %v518_v37, %v534_v24 }
 0x1e0   :  { %v542_v41 = vpack.i.b16 %v541_v36, %v540_v33  ;;  %v560_v42 = vcombine.low %v522_v20, %v538_v34  ;;  %v561_v46 = vcombine.high %v522_v20, %v538_v34  ;;  %v620_v56 = vrot.slane %v612_v39, %v4546_v55 }
 0x1e1   :  { %v627_v16 = vrot.slane %v613_v19, %v4546_v55 }
 0x1e2   :  { %v568_v47 = vrot.slane %v560_v42, %v4546_v55  ;;  %v628_v51 = vcombine.low %v526_v38, %v542_v41  ;;  %v629_v30 = vcombine.high %v526_v38, %v542_v41  ;;  %v575_v24 = vrot.slane %v561_v46, %v4546_v55 }
 0x1e4   :  { %v576_v48 = vcombine.low %v552_v50, %v568_v47  ;;  %v577_v49 = vcombine.high %v552_v50, %v568_v47  ;;  %v636_v58 = vrot.slane %v628_v51, %v4546_v55  ;;  %v643_v61 = vrot.slane %v629_v30, %v4546_v55 }
 0x1e5   :  { %v559_v30 = vrot.slane %v545_v7, %v4546_v55 }
 0x1e6   :  { %v584_v8 = vrot.slane %v576_v48, %v4553_v3  ;;  %v591_v10 = vrot.slane %v577_v49, %v4553_v3  ;;  %v644_v25 = vcombine.low %v620_v56, %v636_v58  ;;  %v645_v27 = vcombine.high %v620_v56, %v636_v58 }
 0x1e7   :  { %v660_v36 = vcombine.low %v627_v16, %v643_v61  ;;  %v661_v37 = vcombine.high %v627_v16, %v643_v61  ;;  %v592_v19 = vcombine.low %v559_v30, %v575_v24  ;;  %v593_v41 = vcombine.high %v559_v30, %v575_v24 }
 0x1e8   :  { %v680_v20 = vcombine.low %v584_v8, %v591_v10  ;;  %v3884_v33 = vcombine.high %v584_v8, %v591_v10  ;;  %v652_v34 = vrot.slane %v644_v25, %v4553_v3  ;;  %v659_v39 = vrot.slane %v645_v27, %v4553_v3 }
 0x1e9   :  { %v668_v50 = vrot.slane %v660_v36, %v4553_v3  ;;  %v675_v47 = vrot.slane %v661_v37, %v4553_v3  ;;  %v600_v56 = vrot.slane %v592_v19, %v4553_v3  ;;  %v607_v58 = vrot.slane %v593_v41, %v4553_v3 }
 0x1ea   :  { %v687_v59 = vrot.slane %v680_v20, %v4546_v55  ;;  %v695_v62 = vrot.slane %v3884_v33, %v4546_v55  ;;  %v714_v38 = vcombine.low %v652_v34, %v659_v39  ;;  %v3885_v42 = vcombine.high %v652_v34, %v659_v39 }
 0x1eb   :  { %v782_v8 = vcombine.low %v668_v50, %v675_v47  ;;  %v3887_v10 = vcombine.high %v668_v50, %v675_v47  ;;  %v748_v20 = vcombine.low %v600_v56, %v607_v58  ;;  %v3886_v33 = vcombine.high %v600_v56, %v607_v58 }
 0x1ec   :  { %v721_v51 = vrot.slane %v714_v38, %v4546_v55  ;;  %v696_v46 = vcombine.low %v687_v59, %v695_v62  ;;  %v729_v48 = vrot.slane %v3885_v42, %v4546_v55  ;;  %v697_v49 = vcombine.high %v687_v59, %v695_v62 }
 0x1ed   :  { %v789_v36 = vrot.slane %v782_v8, %v4546_v55  ;;  %v797_v37 = vrot.slane %v3887_v10, %v4546_v55  ;;  %v755_v19 = vrot.slane %v748_v20, %v4546_v55  ;;  %v763_v41 = vrot.slane %v3886_v33, %v4546_v55 }
 0x1ee   :  { %v730_v61 = vcombine.low %v721_v51, %v729_v48  ;;  %v731_v7 = vcombine.high %v721_v51, %v729_v48  ;;  %v704_v16 = vrot.slane %v696_v46, %v4553_v3  ;;  %v4716_v27 = vrot.slane %v697_v49, %v4553_v3 }
 0x1ef   :  { %v798_v46 = vcombine.low %v789_v36, %v797_v37  ;;  %v764_v48 = vcombine.low %v755_v19, %v763_v41  ;;  %v799_v10 = vcombine.high %v789_v36, %v797_v37  ;;  %v5510_v37 = vpack.i.b16 %v4653_v21, %v4599_v57 }
 0x1f0   :  { %v738_v25 = vrot.slane %v730_v61, %v4553_v3  ;;  %v4719_v24 = vrot.slane %v731_v7, %v4553_v3  ;;  %v819_v42 = vshrl.u32 %v704_v16, 16  ;;  %v4737_v50 = vcombine.high %v4716_v27, %v4442_v2 }
 0x1f1   :  { %v4753_v61 = vrot.slane %v798_v46, %v4553_v3  ;;  %v712_v52 = vcombine.high %v704_v16, %v4442_v2  ;;  %v4761_v53 = vrot.slane %v764_v48, %v4553_v3  ;;  %v831_v54 = vshrl.u32 %v4716_v27, 16 }
 0x1f2   :  { %v818_v34 = vpack.i.b16 %v738_v25, %v704_v16  ;;  %v830_v39 = vpack.i.b16 %v4719_v24, %v4716_v27  ;;  %v820_v62 = vshrl.u32 %v738_v25, 16  ;;  %v4729_v38 = vcombine.high %v4719_v24, %v4442_v2 }
 0x1f3   :  { %v746_v58 = vcombine.high %v738_v25, %v4442_v2  ;;  %v842_v6 = vpack.i.b16 %v4753_v61, %v4761_v53  ;;  %v4777_v8 = vcombine.high %v4753_v61, %v4442_v2  ;;  %v825_v60 = vshrl.u32 %v712_v52, 16 }
 0x1f4   :  { %v1236_v30 = vsel %vm1231_vm2, %v818_v34, 0  ;;  %v1420_v59 = vsel %vm1231_vm2, %v830_v39, 0  ;;  %v821_v47 = vpack.i.b16 %v820_v62, %v819_v42  ;;  %v836_v51 = vpack.i.b16 %v4729_v38, %v4737_v50 }
 0x1f5   :  { %4035 = vmatpush3.bf16.xpose.msra.mxu1 %v1236_v30  ;;  %4059 = vmatpush3.bf16.xpose.msra.mxu0 %v1420_v59  ;;  %v824_v5 = vpack.i.b16 %v746_v58, %v712_v52  ;;  %v826_v7 = vshrl.u32 %v746_v58, 16  ;;  %v780_v17 = vcombine.high %v4761_v53, %v4442_v2  ;;  %v765_v16 = vcombine.high %v755_v19, %v763_v41 }
 0x1f6   :  { %4040 = vmatprep.subr.bf16.mxu1 %v4453_v1  ;;  %4070 = vmatprep.subr.bf16.mxu0 %v4453_v1  ;;  %v1282_v49 = vsel %vm1231_vm2, %v821_v47, 0  ;;  %v1512_v56 = vsel %vm1231_vm2, %v836_v51, 0  ;;  %v832_v33 = vshrl.u32 %v4719_v24, 16  ;;  %v813_v34 = vrot.slane %v799_v10, %v4553_v3 }
 0x1f7   :  { %v779_v63 = vrot.slane %v765_v16, %v4553_v3  ;;  %v838_v24 = vshrl.u32 %v4729_v38, 16  ;;  %v837_v4 = vshrl.u32 %v4737_v50, 16  ;;  %v844_v62 = vshrl.u32 %v4753_v61, 16 }
 0x1f8   :  { %v833_v0 = vpack.i.b16 %v832_v33, %v831_v54  ;;  %v815_v39 = vcombine.high %v813_v34, %v4442_v2  ;;  %v5511_v21 = vpack.i.b16 %v4672_v32, %v4634_v12  ;;  %v850_v19 = vshrl.u32 %v4777_v8, 16 }
 0x1f9   :  { %v781_v11 = vcombine.high %v779_v63, %v4442_v2  ;;  %v849_v41 = vshrl.u32 %v780_v17, 16  ;;  %v856_v32 = vshrl.u32 %v813_v34, 16  ;;  %v855_v42 = vshrl.u32 %v779_v63, 16 }
 0x1fa   :  { %v862_v51 = vshrl.u32 %v815_v39, 16 }
 0x1fb   :  { %v860_v36 = vpack.i.b16 %v815_v39, %v781_v11  ;;  %v857_v50 = vpack.i.b16 %v856_v32, %v855_v42 }
 0x1fc   :  { %4037 = vmatmul.mubr.msk.bf16.vlgmr.msra.gmra.mrb[0].mxu1 %vm1231_vm2, %v450_v14  ;;  %4061 = vmatmul.mubr.msk.bf16.vlgmr.msra.gmra.mrb[4].mxu0 %vm1231_vm2, %v462_v15  ;;  %v1328_v14 = vsel %vm1231_vm2, %v824_v5, 0  ;;  %v1604_v15 = vsel %vm1231_vm2, %v842_v6, 0 }
 0x1fd   :  { %4041 = vmatpush3.bf16.xpose.msra.mxu1 %v1282_v49  ;;  %4071 = vmatpush3.bf16.xpose.msra.mxu0 %v1512_v56  ;;  %v1880_v59 = vsel %vm1231_vm2, %v860_v36, 0  ;;  %v1834_v47 = vsel %vm1231_vm2, %v857_v50, 0 }
 0x1fe   :  { %4042 = vmatprep.mubr.msk.bf16.mxu1 %vm4454_vm1, %v4453_v1  ;;  %4072 = vmatprep.mubr.msk.bf16.mxu0 %vm4454_vm1, %v4453_v1 }
 0x1ff   :  { %4046 = vmatprep.subr.bf16.mxu1 %v4453_v1  ;;  %4082 = vmatprep.subr.bf16.mxu0 %v4453_v1 }
 0x204   :  { %4043 = vmatmul.mubr.msk.bf16.vlgmr.msra.gmra.mrb[4].mxu1 %vm1231_vm2, %v4655_v22  ;;  %4073 = vmatmul.mubr.msk.bf16.vlgmr.msra.gmra.mrb[8].mxu0 %vm1231_vm2, %v468_v23  ;;  %v827_v22 = vpack.i.b16 %v826_v7, %v825_v60  ;;  %v848_v23 = vpack.i.b16 %v4777_v8, %v780_v17 }
 0x205   :  { %4047 = vmatpush3.bf16.xpose.msra.mxu1 %v1328_v14  ;;  %4083 = vmatpush3.bf16.xpose.msra.mxu0 %v1604_v15 }
 0x206   :  { %4048 = vmatprep.mubr.msk.bf16.mxu1 %vm4454_vm1, %v4453_v1  ;;  %4084 = vmatprep.mubr.msk.bf16.mxu0 %vm4454_vm1, %v4453_v1  ;;  %v1374_v25 = vsel %vm1231_vm2, %v827_v22, 0  ;;  %v1696_v20 = vsel %vm1231_vm2, %v848_v23, 0 }
 0x207   :  { %4052 = vmatprep.subr.bf16.mxu1 %v4453_v1  ;;  %4094 = vmatprep.subr.bf16.mxu0 %v4453_v1 }
 0x20c   :  { %4049 = vmatmul.mubr.msk.bf16.vlgmr.msra.gmra.mrb[8].mxu1 %vm1231_vm2, %v456_v26  ;;  %4085 = vmatmul.mubr.msk.bf16.vlgmr.msra.gmra.mrb[12].mxu0 %vm1231_vm2, %v474_v9  ;;  %v854_v9 = vpack.i.b16 %v813_v34, %v779_v63  ;;  %v1466_v26 = vsel %vm1231_vm2, %v833_v0, 0 }
 0x20d   :  { %4053 = vmatpush3.bf16.xpose.msra.mxu1 %v1374_v25  ;;  %4095 = vmatpush3.bf16.xpose.msra.mxu0 %v1696_v20 }
 0x20e   :  { %4054 = vmatprep.mubr.msk.bf16.mxu1 %vm4454_vm1, %v4453_v1  ;;  %4096 = vmatprep.mubr.msk.bf16.mxu0 %vm4454_vm1, %v4453_v1  ;;  %v1788_v27 = vsel %vm1231_vm2, %v854_v9, 0 }
 0x20f   :  { %4064 = vmatprep.subr.bf16.mxu1 %v4453_v1  ;;  %4106 = vmatprep.subr.bf16.mxu0 %v4453_v1 }
 0x214   :  { %4055 = vmatmul.mubr.msk.bf16.vlgmr.msra.gmra.mrb[12].mxu1 %vm1231_vm2, %v4676_v35  ;;  %4097 = vmatmul.mubr.msk.bf16.vlgmr.msra.gmra.mrb[16].mxu0 %vm1231_vm2, %v5509_v18  ;;  %v839_v35 = vpack.i.b16 %v838_v24, %v837_v4 }
 0x215   :  { %4065 = vmatpush3.bf16.xpose.msra.mxu1 %v1466_v26  ;;  %4107 = vmatpush3.bf16.xpose.msra.mxu0 %v1788_v27 }
 0x216   :  { %4066 = vmatprep.mubr.msk.bf16.mxu1 %vm4454_vm1, %v4453_v1  ;;  %4108 = vmatprep.mubr.msk.bf16.mxu0 %vm4454_vm1, %v4453_v1  ;;  %v1558_v30 = vsel %vm1231_vm2, %v839_v35, 0 }
 0x217   :  { %4076 = vmatprep.subr.bf16.mxu1 %v4453_v1  ;;  %4118 = vmatprep.subr.bf16.mxu0 %v4453_v1 }
 0x21c   :  { %4067 = vmatmul.mubr.msk.bf16.vlgmr.msra.gmra.mrb[16].mxu1 %vm1231_vm2, %v4664_v29  ;;  %4109 = vmatmul.mubr.msk.bf16.vlgmr.msra.gmra.mrb[20].mxu0 %vm1231_vm2, %v5510_v37  ;;  %v843_v29 = vshrl.u32 %v4761_v53, 16 }
 0x21d   :  { %4077 = vmatpush3.bf16.xpose.msra.mxu1 %v1558_v30  ;;  %4119 = vmatpush3.bf16.xpose.msra.mxu0 %v1880_v59 }
 0x21e   :  { %4078 = vmatprep.mubr.msk.bf16.mxu1 %vm4454_vm1, %v4453_v1  ;;  %4120 = vmatprep.mubr.msk.bf16.mxu0 %vm4454_vm1, %v4453_v1  ;;  %v845_v57 = vpack.i.b16 %v844_v62, %v843_v29 }
 0x21f   :  { %4088 = vmatprep.subr.bf16.mxu1 %v4453_v1  ;;  %4130 = vmatprep.subr.bf16.mxu0 %v4453_v1 }
 0x220   :  { %v1650_v38 = vsel %vm1231_vm2, %v845_v57, 0 }
 0x224   :  { %4079 = vmatmul.mubr.msk.bf16.vlgmr.msra.gmra.mrb[20].mxu1 %vm1231_vm2, %v4668_v31  ;;  %4121 = vmatmul.mubr.msk.bf16.vlgmr.msra.gmra.mrb[24].mxu0 %vm1231_vm2, %v5511_v21  ;;  %v851_v31 = vpack.i.b16 %v850_v19, %v849_v41 }
 0x225   :  { %4089 = vmatpush3.bf16.xpose.msra.mxu1 %v1650_v38  ;;  %4090 = vmatprep.mubr.msk.bf16.mxu1 %vm4454_vm1, %v4453_v1 }
 0x226   :  { %4100 = vmatprep.subr.bf16.mxu1 %v4453_v1  ;;  %4132 = vmatprep.mubr.msk.bf16.mxu0 %vm4454_vm1, %v4453_v1  ;;  %v1742_v12 = vsel %vm1231_vm2, %v851_v31, 0 }
 0x22c   :  { %4091 = vmatmul.mubr.msk.bf16.vlgmr.msra.gmra.mrb[24].mxu1 %vm1231_vm2, %v4683_v40  ;;  %v861_v40 = vshrl.u32 %v781_v11, 16 }
 0x22d   :  { %4101 = vmatpush3.bf16.xpose.msra.mxu1 %v1742_v12  ;;  %4102 = vmatprep.mubr.msk.bf16.mxu1 %vm4454_vm1, %v4453_v1 }
 0x22e   :  { %4112 = vmatprep.subr.bf16.mxu1 %v4453_v1  ;;  %v863_v46 = vpack.i.b16 %v862_v51, %v861_v40 }
 0x230   :  { %v1926_v48 = vsel %vm1231_vm2, %v863_v46, 0 }
 0x234   :  { %4103 = vmatmul.mubr.msk.bf16.vlgmr.msra.gmra.mrb[28].mxu1 %vm1231_vm2, %v4687_v43 }
 0x235   :  { %4113 = vmatpush3.bf16.xpose.msra.mxu1 %v1834_v47  ;;  %4114 = vmatprep.mubr.msk.bf16.mxu1 %vm4454_vm1, %v4453_v1 }
 0x236   :  { %4124 = vmatprep.subr.bf16.mxu1 %v4453_v1 }
 0x23c   :  { %4115 = vmatmul.mubr.msk.bf16.vlgmr.msra.gmra.mrb[32].mxu1 %vm1231_vm2, %v4689_v44 }
 0x23d   :  { %4125 = vmatpush3.bf16.xpose.msra.mxu1 %v1926_v48  ;;  %4126 = vmatprep.mubr.msk.bf16.mxu1 %vm4454_vm1, %v4453_v1 }
 0x23e   :  { %4136 = vmatprep.subr.bf16.mxu1 %v4453_v1 }
 0x244   :  { %4127 = vmatmul.mubr.msk.bf16.vlgmr.msra.gmra.mrb[36].mxu1 %vm1231_vm2, %v4691_v45 }
 0x245   :  { %4138 = vmatprep.mubr.msk.bf16.mxu1 %vm4454_vm1, %v4453_v1 }
 0x2cf   :  { %v4877_v43 = vpop.f32.mrb[0].mxu1  ;;  %v4879_v49 = vpop.f32.mrb[4].mxu0 }
 0x2d0   :  { %v4038_v56 = vpop.f32.mrb[1].mxu1  ;;  %v4062_v44 = vpop.f32.mrb[5].mxu0  ;;  %v1980_v58 = vsel %vm1231_vm2, %v4879_v49, -inf  ;;  %v1968_v61 = vsel %vm1231_vm2, %v4877_v43, -inf }
 0x2d1   :  { %1981 = vmax.xlane.f32.xlu0 %v1980_v58  ;;  %v1459_v52 = vpop.f32.mrb[6].mxu0  ;;  %1969 = vmax.xlane.f32.xlu1 %v1968_v61  ;;  %v1275_v53 = vpop.f32.mrb[2].mxu1 }
 0x2d2   :  { %v4039_v45 = vpop.f32.mrb[3].mxu1  ;;  %v4063_v5 = vpop.f32.mrb[7].mxu0 }
 0x2d7   :  { %v4885_v6 = vpop.f32.mrb[4].mxu1  ;;  %v4887_v14 = vpop.f32.mrb[8].mxu0 }
 0x2d8   :  { %v4044_v15 = vpop.f32.mrb[5].mxu1  ;;  %v4074_v7 = vpop.f32.mrb[9].mxu0  ;;  %v1971_v8 = vsel %vm1231_vm2, %v4885_v6, -inf  ;;  %v1986_v10 = vsel %vm1231_vm2, %v4887_v14, -inf }
 0x2d9   :  { %v1551_v60 = vpop.f32.mrb[10].mxu0  ;;  %1972 = vmax.xlane.f32.xlu0 %v1971_v8  ;;  %v1321_v17 = vpop.f32.mrb[6].mxu1 }
 0x2da   :  { %v4045_v22 = vpop.f32.mrb[7].mxu1  ;;  %v4075_v23 = vpop.f32.mrb[11].mxu0 }
 0x2dd   :  { %1987 = vmax.xlane.f32.xlu0 %v1986_v10 }
 0x2df   :  { %v4893_v16 = vpop.f32.mrb[8].mxu1  ;;  %v4895_v25 = vpop.f32.mrb[12].mxu0 }
 0x2e0   :  { %v4050_v20 = vpop.f32.mrb[9].mxu1  ;;  %v4086_v33 = vpop.f32.mrb[13].mxu0  ;;  %v1974_v34 = vsel %vm1231_vm2, %v4893_v16, -inf  ;;  %v1992_v7 = vsel %vm1231_vm2, %v4895_v25, -inf }
 0x2e1   :  { %v1643_v54 = vpop.f32.mrb[14].mxu0  ;;  %1975 = vmax.xlane.f32.xlu0 %v1974_v34  ;;  %v1367_v63 = vpop.f32.mrb[10].mxu1 }
 0x2e2   :  { %v4051_v0 = vpop.f32.mrb[11].mxu1  ;;  %v4087_v9 = vpop.f32.mrb[15].mxu0 }
 0x2e3   :  { %v4945_v9 = vpop.permute.xlu1 %867 }
 0x2e7   :  { %v4899_v18 = vpop.f32.mrb[12].mxu1  ;;  %v4901_v26 = vpop.f32.mrb[16].mxu0 }
 0x2e8   :  { %v4056_v27 = vpop.f32.mrb[13].mxu1  ;;  %v4098_v24 = vpop.f32.mrb[17].mxu0  ;;  %v1977_v39 = vsel %vm1231_vm2, %v4899_v18, -inf  ;;  %v1998_v22 = vsel %vm1231_vm2, %v4901_v26, -inf }
 0x2e9   :  { %v1735_v4 = vpop.f32.mrb[18].mxu0  ;;  %1978 = vmax.xlane.f32.xlu1 %v1977_v39  ;;  %v1413_v11 = vpop.f32.mrb[14].mxu1 }
 0x2ea   :  { %v4057_v35 = vpop.f32.mrb[15].mxu1  ;;  %v4099_v36 = vpop.f32.mrb[19].mxu0 }
 0x2eb   :  { %v4947_v27 = vpop.permute.xlu1 %869  ;;  %v4949_v24 = vpop.permute.xlu0 %865 }
 0x2ef   :  { %v4905_v37 = vpop.f32.mrb[16].mxu1  ;;  %v4907_v30 = vpop.f32.mrb[20].mxu0 }
 0x2f0   :  { %v4068_v59 = vpop.f32.mrb[17].mxu1  ;;  %v4110_v62 = vpop.f32.mrb[21].mxu0  ;;  %v1983_v29 = vsel %vm1231_vm2, %v4905_v37, -inf  ;;  %v2004_v10 = vsel %vm1231_vm2, %v4907_v30, -inf }
 0x2f1   :  { %v1827_v57 = vpop.f32.mrb[22].mxu0  ;;  %1984 = vmax.xlane.f32.xlu1 %v1983_v29  ;;  %v1505_v21 = vpop.f32.mrb[18].mxu1 }
 0x2f2   :  { %v4069_v38 = vpop.f32.mrb[19].mxu1  ;;  %v4111_v19 = vpop.f32.mrb[23].mxu0 }
 0x2f7   :  { %v4911_v41 = vpop.f32.mrb[24].mxu0  ;;  %871 = vrot.lane.b32.xlu0 %v4530_v28, %s4445_s14  ;;  %v4915_v31 = vpop.f32.mrb[20].mxu1 }
 0x2f8   :  { %v4080_v12 = vpop.f32.mrb[21].mxu1  ;;  %v4122_v32 = vpop.f32.mrb[25].mxu0  ;;  %v2010_v20 = vsel %vm1231_vm2, %v4911_v41, -inf  ;;  %v1989_v33 = vsel %vm1231_vm2, %v4915_v31, -inf }
 0x2f9   :  { %v1597_v42 = vpop.f32.mrb[22].mxu1  ;;  %v1919_v50 = vpop.f32.mrb[26].mxu0 }
 0x2fa   :  { %v4081_v47 = vpop.f32.mrb[23].mxu1  ;;  %v4123_v51 = vpop.f32.mrb[27].mxu0 }
 0x2ff   :  { %v4917_v40 = vpop.f32.mrb[24].mxu1 }
 0x300   :  { %v4092_v46 = vpop.f32.mrb[25].mxu1  ;;  %v1995_v34 = vsel %vm1231_vm2, %v4917_v40, -inf }
 0x301   :  { %v1689_v48 = vpop.f32.mrb[26].mxu1 }
 0x302   :  { %873 = vrot.lane.b32.xlu1 %v4530_v28, %s4448_s17  ;;  %v4093_v56 = vpop.f32.mrb[27].mxu1 }
 0x307   :  { %v4921_v44 = vpop.f32.mrb[28].mxu1 }
 0x308   :  { %v4104_v58 = vpop.f32.mrb[29].mxu1  ;;  %v2001_v54 = vsel %vm1231_vm2, %v4921_v44, -inf }
 0x309   :  { %v1781_v61 = vpop.f32.mrb[30].mxu1 }
 0x30a   :  { %v4105_v52 = vpop.f32.mrb[31].mxu1 }
 0x30f   :  { %v4923_v53 = vpop.f32.mrb[32].mxu1 }
 0x310   :  { %v4116_v45 = vpop.f32.mrb[33].mxu1  ;;  %v2007_v63 = vsel %vm1231_vm2, %v4923_v53, -inf }
 0x311   :  { %v1873_v5 = vpop.f32.mrb[34].mxu1 }
 0x312   :  { %v4117_v15 = vpop.f32.mrb[35].mxu1 }
 0x316   :  { %1993 = vmax.xlane.f32.xlu0 %v1992_v7 }
 0x317   :  { %v4927_v8 = vpop.f32.mrb[36].mxu1 }
 0x318   :  { %v4128_v60 = vpop.f32.mrb[37].mxu1  ;;  %v2013_v0 = vsel %vm1231_vm2, %v4927_v8, -inf }
 0x319   :  { %v1965_v17 = vpop.f32.mrb[38].mxu1 }
 0x31a   :  { %1999 = vmax.xlane.f32.xlu0 %v1998_v22  ;;  %v4129_v23 = vpop.f32.mrb[39].mxu1 }
 0x31e   :  { %2005 = vmax.xlane.f32.xlu0 %v2004_v10 }
 0x322   :  { %2011 = vmax.xlane.f32.xlu0 %v2010_v20 }
 0x326   :  { %1990 = vmax.xlane.f32.xlu1 %v1989_v33 }
 0x32a   :  { %1996 = vmax.xlane.f32.xlu1 %v1995_v34 }
 0x32e   :  { %2002 = vmax.xlane.f32.xlu1 %v2001_v54 }
 0x332   :  { %2008 = vmax.xlane.f32.xlu1 %v2007_v63 }
 0x336   :  { %2014 = vmax.xlane.f32.xlu1 %v2013_v0 }
 0x35e   :  { %v1970_v39 = vpop.xlane.xlu1 %1969  ;;  %v1982_v35 = vpop.xlane.xlu0 %1981 }
 0x35f   :  { %v2016_v4 = vsub.f32 %v4877_v43, %v1970_v39  ;;  %v2020_v56 = vsub.f32 %v4879_v49, %v1982_v35 }
 0x361   :  { %v2032_v11 = vmul.f32 1.442695, %v2016_v4  ;;  %v2040_v52 = vmul.f32 1.442695, %v2020_v56 }
 0x363   :  { %4343 = vpow2.f32 %v2032_v11 }
 0x366   :  { %v1973_v36 = vpop.xlane.xlu0 %1972 }
 0x367   :  { %v2017_v59 = vsub.f32 %v4885_v6, %v1973_v36 }
 0x369   :  { %v2034_v62 = vmul.f32 1.442695, %v2017_v59 }
 0x36a   :  { %v1988_v21 = vpop.xlane.xlu0 %1987 }
 0x36b   :  { %4345 = vpow2.f32 %v2034_v62  ;;  %v2022_v5 = vsub.f32 %v4887_v14, %v1988_v21 }
 0x36d   :  { %v4953_v29 = vpop.eup %4343  ;;  %v2044_v60 = vmul.f32 1.442695, %v2022_v5 }
 0x36e   :  { %v2064_v57 = vsel %vm1231_vm2, %v4953_v29, 0.0  ;;  %v1976_v19 = vpop.xlane.xlu0 %1975 }
 0x36f   :  { %2065 = vadd.xlane.f32.xlu0 %v2064_v57  ;;  %v2018_v48 = vsub.f32 %v4893_v16, %v1976_v19 }
 0x371   :  { %v2036_v58 = vmul.f32 1.442695, %v2018_v48 }
 0x372   :  { %v872_v42 = vpop.permute.xlu0 %871 }
 0x373   :  { %v899_v50 = vshrl.u32 %v872_v42, 16  ;;  %4347 = vpow2.f32 %v2036_v58 }
 0x374   :  { %4349 = vpow2.f32 %v2040_v52 }
 0x375   :  { %v4957_v38 = vpop.eup %4345 }
 0x376   :  { %v2067_v43 = vsel %vm1231_vm2, %v4957_v38, 0.0  ;;  %v1979_v12 = vpop.xlane.xlu1 %1978 }
 0x377   :  { %2068 = vadd.xlane.f32.xlu1 %v2067_v43  ;;  %v2019_v61 = vsub.f32 %v4899_v18, %v1979_v12 }
 0x379   :  { %v2038_v15 = vmul.f32 1.442695, %v2019_v61 }
 0x37b   :  { %4351 = vpow2.f32 %v2038_v15 }
 0x37d   :  { %v4974_v17 = vpop.eup %4347 }
 0x37e   :  { %v1985_v32 = vpop.xlane.xlu1 %1984  ;;  %v2070_v18 = vsel %vm1231_vm2, %v4974_v17, 0.0  ;;  %v4979_v22 = vpop.eup %4349 }
 0x37f   :  { %v2021_v45 = vsub.f32 %v4905_v37, %v1985_v32  ;;  %v2076_v20 = vsel %vm1231_vm2, %v4979_v22, 0.0 }
 0x381   :  { %v2042_v7 = vmul.f32 1.442695, %v2021_v45 }
 0x382   :  { %v874_v6 = vpop.permute.xlu1 %873 }
 0x383   :  { %v4961_v47 = vpack.i.b16 %v874_v6, %v872_v42  ;;  %v900_v51 = vshrl.u32 %v874_v6, 16  ;;  %4353 = vpow2.f32 %v2042_v7 }
 0x384   :  { %4355 = vpow2.f32 %v2044_v60 }
 0x385   :  { %v4963_v46 = vpack.i.b16 %v900_v51, %v899_v50  ;;  %875 = vrot.lane.b32.xlu0 %v4530_v28, %s4447_s16  ;;  %v4981_v23 = vpop.eup %4351 }
 0x386   :  { %v2073_v54 = vsel %vm1231_vm2, %v4981_v23, 0.0 }
 0x388   :  { %877 = vrot.lane.b32.xlu1 %v4530_v28, %s4450_s19 }
 0x38d   :  { %v4986_v33 = vpop.eup %4353 }
 0x38e   :  { %v4990_v63 = vpop.eup %4355  ;;  %v2079_v39 = vsel %vm1231_vm2, %v4986_v33, 0.0 }
 0x38f   :  { %v2082_v11 = vsel %vm1231_vm2, %v4990_v63, 0.0 }
 0x3a3   :  { %v1994_v16 = vpop.xlane.xlu0 %1993 }
 0x3a4   :  { %v2024_v49 = vsub.f32 %v4895_v25, %v1994_v16  ;;  %2071 = vadd.xlane.f32.xlu0 %v2070_v18 }
 0x3a6   :  { %v2048_v37 = vmul.f32 1.442695, %v2024_v49 }
 0x3a7   :  { %v2000_v14 = vpop.xlane.xlu0 %1999 }
 0x3a8   :  { %4357 = vpow2.f32 %v2048_v37  ;;  %v2026_v10 = vsub.f32 %v4901_v26, %v2000_v14  ;;  %2077 = vadd.xlane.f32.xlu0 %v2076_v20  ;;  %v881_v20 = vpack.i.b16 %v4949_v24, %v4530_v28 }
 0x3aa   :  { %v2052_v25 = vmul.f32 1.442695, %v2026_v10 }
 0x3ab   :  { %v2006_v34 = vpop.xlane.xlu0 %2005 }
 0x3ac   :  { %4359 = vpow2.f32 %v2052_v25  ;;  %v2028_v0 = vsub.f32 %v4907_v30, %v2006_v34  ;;  %2074 = vadd.xlane.f32.xlu1 %v2073_v54  ;;  %2080 = vadd.xlane.f32.xlu0 %v2079_v39  ;;  %v884_v25 = vshrl.u32 %v4949_v24, 16  ;;  %v892_v34 = vshrl.u32 %v4947_v27, 16 }
 0x3ad   :  { %v891_v39 = vshrl.u32 %v4945_v9, 16 }
 0x3ae   :  { %v2056_v26 = vmul.f32 1.442695, %v2028_v0  ;;  %v911_v0 = vcombine.low %v881_v20, %v4961_v47 }
 0x3af   :  { %v2012_v4 = vpop.xlane.xlu0 %2011  ;;  %v893_v24 = vpack.i.b16 %v892_v34, %v891_v39 }
 0x3b0   :  { %4361 = vpow2.f32 %v2056_v26  ;;  %v2030_v35 = vsub.f32 %v4911_v41, %v2012_v4  ;;  %2083 = vadd.xlane.f32.xlu1 %v2082_v11  ;;  %v883_v26 = vshrl.u32 %v4530_v28, 16  ;;  %v912_v4 = vcombine.high %v881_v20, %v4961_v47 }
 0x3b2   :  { %v4998_v36 = vpop.eup %4357  ;;  %v2060_v59 = vmul.f32 1.442695, %v2030_v35  ;;  %v889_v35 = vpack.i.b16 %v4947_v27, %v4945_v9 }
 0x3b3   :  { %v1991_v62 = vpop.xlane.xlu1 %1990  ;;  %v2088_v30 = vsel %vm1231_vm2, %v4998_v36, 0.0 }
 0x3b4   :  { %4363 = vpow2.f32 %v2060_v59  ;;  %v2023_v57 = vsub.f32 %v4915_v31, %v1991_v62  ;;  %2089 = vadd.xlane.f32.xlu1 %v2088_v30 }
 0x3b6   :  { %v5003_v21 = vpop.eup %4359  ;;  %v2046_v43 = vmul.f32 1.442695, %v2023_v57  ;;  %v885_v57 = vpack.i.b16 %v884_v25, %v883_v26 }
 0x3b7   :  { %v1997_v19 = vpop.xlane.xlu1 %1996  ;;  %v2094_v12 = vsel %vm1231_vm2, %v5003_v21, 0.0 }
 0x3b8   :  { %4365 = vpow2.f32 %v2046_v43  ;;  %v2025_v41 = vsub.f32 %v4917_v40, %v1997_v19  ;;  %2095 = vadd.xlane.f32.xlu1 %v2094_v12  ;;  %v919_v43 = vrot.slane %v911_v0, %v4546_v55  ;;  %v979_v28 = vcombine.low %v885_v57, %v4963_v46 }
 0x3b9   :  { %v980_v47 = vcombine.high %v885_v57, %v4963_v46 }
 0x3ba   :  { %v5008_v32 = vpop.eup %4361  ;;  %v2050_v42 = vmul.f32 1.442695, %v2025_v41 }
 0x3bb   :  { %v2003_v6 = vpop.xlane.xlu1 %2002  ;;  %v2100_v50 = vsel %vm1231_vm2, %v5008_v32, 0.0 }
 0x3bc   :  { %4367 = vpow2.f32 %v2050_v42  ;;  %v2027_v31 = vsub.f32 %v4921_v44, %v2003_v6  ;;  %2101 = vadd.xlane.f32.xlu1 %v2100_v50  ;;  %v926_v42 = vrot.slane %v912_v4, %v4546_v55 }
 0x3be   :  { %v5013_v51 = vpop.eup %4363  ;;  %v2054_v48 = vmul.f32 1.442695, %v2027_v31 }
 0x3bf   :  { %v2009_v56 = vpop.xlane.xlu1 %2008  ;;  %v2106_v58 = vsel %vm1231_vm2, %v5013_v51, 0.0 }
 0x3c0   :  { %4369 = vpow2.f32 %v2054_v48  ;;  %v2029_v40 = vsub.f32 %v4923_v53, %v2009_v56  ;;  %2107 = vadd.xlane.f32.xlu1 %v2106_v58 }
 0x3c2   :  { %v5018_v61 = vpop.eup %4365  ;;  %v2058_v52 = vmul.f32 1.442695, %v2029_v40  ;;  %v987_v40 = vrot.slane %v979_v28, %v4546_v55 }
 0x3c3   :  { %v2015_v45 = vpop.xlane.xlu1 %2014  ;;  %v2085_v5 = vsel %vm1231_vm2, %v5018_v61, 0.0 }
 0x3c4   :  { %4371 = vpow2.f32 %v2058_v52  ;;  %v2031_v44 = vsub.f32 %v4927_v8, %v2015_v45  ;;  %2086 = vadd.xlane.f32.xlu0 %v2085_v5  ;;  %v994_v52 = vrot.slane %v980_v47, %v4546_v55 }
 0x3c6   :  { %v5023_v15 = vpop.eup %4367  ;;  %v2062_v7 = vmul.f32 1.442695, %v2031_v44 }
 0x3c7   :  { %v2091_v60 = vsel %vm1231_vm2, %v5023_v15, 0.0 }
 0x3c8   :  { %4373 = vpow2.f32 %v2062_v7  ;;  %2092 = vadd.xlane.f32.xlu0 %v2091_v60 }
 0x3ca   :  { %v5027_v53 = vpop.eup %4369 }
 0x3cb   :  { %v2097_v16 = vsel %vm1231_vm2, %v5027_v53, 0.0 }
 0x3cc   :  { %2098 = vadd.xlane.f32.xlu0 %v2097_v16 }
 0x3ce   :  { %v5031_v49 = vpop.eup %4371 }
 0x3cf   :  { %v2103_v8 = vsel %vm1231_vm2, %v5031_v49, 0.0 }
 0x3d0   :  { %2104 = vadd.xlane.f32.xlu0 %v2103_v8 }
 0x3d2   :  { %v5035_v18 = vpop.eup %4373 }
 0x3d3   :  { %v2109_v37 = vsel %vm1231_vm2, %v5035_v18, 0.0 }
 0x3d4   :  { %2110 = vadd.xlane.f32.xlu0 %v2109_v37 }
 0x3fc   :  { %v2066_v14 = vpop.xlane.xlu0 %2065 }
 0x3fd   :  { %4375 = vrcp.f32 %v2066_v14 }
 0x400   :  { %v876_v54 = vpop.permute.xlu0 %875 }
 0x401   :  { %v907_v59 = vshrl.u32 %v876_v54, 16 }
 0x404   :  { %v2069_v10 = vpop.xlane.xlu1 %2068 }
 0x405   :  { %4377 = vrcp.f32 %v2069_v10 }
 0x408   :  { %v878_v11 = vpop.permute.xlu1 %877 }
 0x409   :  { %v905_v62 = vpack.i.b16 %v878_v11, %v876_v54  ;;  %v908_v30 = vshrl.u32 %v878_v11, 16 }
 0x40b   :  { %v909_v19 = vpack.i.b16 %v908_v30, %v907_v59  ;;  %v927_v12 = vcombine.low %v889_v35, %v905_v62  ;;  %v928_v41 = vcombine.high %v889_v35, %v905_v62  ;;  %v4376_v62 = vpop.eup %4375 }
 0x40d   :  { %v935_v6 = vrot.slane %v927_v12, %v4546_v55  ;;  %v942_v9 = vrot.slane %v928_v41, %v4546_v55  ;;  %v995_v27 = vcombine.low %v893_v24, %v909_v19  ;;  %v996_v50 = vcombine.high %v893_v24, %v909_v19 }
 0x40f   :  { %v943_v31 = vcombine.low %v919_v43, %v935_v6  ;;  %v944_v48 = vcombine.high %v919_v43, %v935_v6  ;;  %v959_v56 = vcombine.low %v926_v42, %v942_v9  ;;  %v960_v58 = vcombine.high %v926_v42, %v942_v9  ;;  %v4378_v42 = vpop.eup %4377 }
 0x410   :  { %v1003_v45 = vrot.slane %v995_v27, %v4546_v55  ;;  %v1010_v46 = vrot.slane %v996_v50, %v4546_v55 }
 0x411   :  { %v951_v5 = vrot.slane %v943_v31, %v4553_v3  ;;  %v958_v44 = vrot.slane %v944_v48, %v4553_v3  ;;  %v967_v7 = vrot.slane %v959_v56, %v4553_v3  ;;  %v974_v60 = vrot.slane %v960_v58, %v4553_v3 }
 0x412   :  { %v1011_v16 = vcombine.low %v987_v40, %v1003_v45  ;;  %v1012_v8 = vcombine.high %v987_v40, %v1003_v45  ;;  %v1027_v37 = vcombine.low %v994_v52, %v1010_v46  ;;  %v1028_v14 = vcombine.high %v994_v52, %v1010_v46 }
 0x413   :  { %v1047_v10 = vcombine.low %v951_v5, %v958_v44  ;;  %v3888_v20 = vcombine.high %v951_v5, %v958_v44  ;;  %v1115_v25 = vcombine.low %v967_v7, %v974_v60  ;;  %v3890_v34 = vcombine.high %v967_v7, %v974_v60 }
 0x414   :  { %v1019_v54 = vrot.slane %v1011_v16, %v4553_v3  ;;  %v1026_v0 = vrot.slane %v1012_v8, %v4553_v3  ;;  %v1035_v39 = vrot.slane %v1027_v37, %v4553_v3  ;;  %v1042_v26 = vrot.slane %v1028_v14, %v4553_v3 }
 0x415   :  { %v1054_v4 = vrot.slane %v1047_v10, %v4546_v55  ;;  %v1062_v11 = vrot.slane %v3888_v20, %v4546_v55  ;;  %v1122_v35 = vrot.slane %v1115_v25, %v4546_v55  ;;  %v1130_v59 = vrot.slane %v3890_v34, %v4546_v55 }
 0x416   :  { %v1081_v30 = vcombine.low %v1019_v54, %v1026_v0  ;;  %v3889_v57 = vcombine.high %v1019_v54, %v1026_v0  ;;  %v1149_v24 = vcombine.low %v1035_v39, %v1042_v26  ;;  %v3891_v43 = vcombine.high %v1035_v39, %v1042_v26 }
 0x417   :  { %v1063_v19 = vcombine.low %v1054_v4, %v1062_v11  ;;  %v1064_v12 = vcombine.high %v1054_v4, %v1062_v11  ;;  %v1131_v41 = vcombine.low %v1122_v35, %v1130_v59  ;;  %v1132_v48 = vcombine.high %v1122_v35, %v1130_v59 }
 0x418   :  { %v1088_v28 = vrot.slane %v1081_v30, %v4546_v55  ;;  %v1096_v47 = vrot.slane %v3889_v57, %v4546_v55  ;;  %v1156_v6 = vrot.slane %v1149_v24, %v4546_v55  ;;  %v1164_v9 = vrot.slane %v3891_v43, %v4546_v55 }
 0x419   :  { %v1071_v27 = vrot.slane %v1063_v19, %v4553_v3  ;;  %v5077_v50 = vrot.slane %v1064_v12, %v4553_v3  ;;  %v5080_v31 = vrot.slane %v1131_v41, %v4553_v3  ;;  %v2113_v45 = vmul.f32 %v4376_v62, %v4953_v29 }
 0x41a   :  { %v1097_v56 = vcombine.low %v1088_v28, %v1096_v47  ;;  %v1098_v58 = vcombine.high %v1088_v28, %v1096_v47  ;;  %v1165_v40 = vcombine.low %v1156_v6, %v1164_v9  ;;  %v1166_v52 = vcombine.high %v1156_v6, %v1164_v9 }
 0x41b   :  { %v2115_v46 = vmul.f32 %v4378_v42, %v4957_v38  ;;  %v1079_v5 = vcombine.high %v1071_v27, %v4442_v2  ;;  %v5087_v44 = vcombine.high %v5077_v50, %v4442_v2  ;;  %v1186_v60 = vshrl.u32 %v1071_v27, 16 }
 0x41c   :  { %v1105_v7 = vrot.slane %v1097_v56, %v4553_v3  ;;  %v5091_v16 = vrot.slane %v1098_v58, %v4553_v3  ;;  %v5094_v8 = vrot.slane %v1165_v40, %v4553_v3  ;;  %v1198_v29 = vshrl.u32 %v5077_v50, 16 }
 0x41d   :  { %v1192_v37 = vshrl.u32 %v1079_v5, 16  ;;  %v1204_v38 = vshrl.u32 %v5087_v44, 16  ;;  %v5100_v14 = vcombine.high %v5080_v31, %v4442_v2  ;;  %v1146_v24 = vrot.slane %v1132_v48, %v4553_v3 }
 0x41e   :  { %v1185_v10 = vpack.i.b16 %v1105_v7, %v1071_v27  ;;  %v1187_v20 = vshrl.u32 %v1105_v7, 16  ;;  %v1113_v25 = vcombine.high %v1105_v7, %v4442_v2  ;;  %v1197_v34 = vpack.i.b16 %v5091_v16, %v5077_v50 }
 0x41f   :  { %v1199_v54 = vshrl.u32 %v5091_v16, 16  ;;  %v5108_v0 = vcombine.high %v5091_v16, %v4442_v2  ;;  %v1209_v39 = vpack.i.b16 %v5094_v8, %v5080_v31  ;;  %v5114_v26 = vcombine.high %v5094_v8, %v4442_v2 }
 0x420   :  { %v2165_v4 = vsel %vm2163_vm3, %v1185_v10, 0  ;;  %v1188_v11 = vpack.i.b16 %v1187_v20, %v1186_v60  ;;  %v1191_v35 = vpack.i.b16 %v1113_v25, %v1079_v5  ;;  %v1193_v59 = vshrl.u32 %v1113_v25, 16 }
 0x421   :  { %4131 = vmatpush3.bf16.msra.mxu0 %v2165_v4  ;;  %v5117_v62 = vpack.i.b16 %v1199_v54, %v1198_v29  ;;  %v1203_v30 = vpack.i.b16 %v5108_v0, %v5087_v44  ;;  %v1205_v57 = vshrl.u32 %v5108_v0, 16  ;;  %v2144_v19 = vpack.c.bf16 %v2113_v45, %v2113_v45 }
 0x422   :  { %v2211_v43 = vsel %vm2163_vm3, %v1188_v11, 0  ;;  %4142 = vmatprep.subr.bf16.mxu0 %v4453_v1  ;;  %v1194_v12 = vpack.i.b16 %v1193_v59, %v1192_v37  ;;  %v2145_v41 = vpack.c.bf16 %v2115_v46, %v2115_v46  ;;  %v1215_v28 = vpack.i.b16 %v5114_v26, %v5100_v14 }
 0x423   :  { %4137 = vmatpush3.bf16.msra.mxu1 %v2211_v43  ;;  %v5125_v42 = vpack.i.b16 %v1205_v57, %v1204_v38  ;;  %v2257_v47 = vsel %vm2163_vm3, %v1191_v35, 0  ;;  %v1210_v6 = vshrl.u32 %v5080_v31, 16  ;;  %v1211_v9 = vshrl.u32 %v5094_v8, 16 }
 0x424   :  { %4133 = vmatmul.mubr.msk.bf16.vlgmr.msra.gmra.mrb[28].mxu0 %vm1231_vm2, %v2144_v19  ;;  %4148 = vmatprep.subr.bf16.mxu1 %v4453_v1  ;;  %v1180_v27 = vrot.slane %v1166_v52, %v4553_v3  ;;  %v1216_v48 = vshrl.u32 %v5100_v14, 16  ;;  %v1217_v56 = vshrl.u32 %v5114_v26, 16  ;;  %v1148_v58 = vcombine.high %v1146_v24, %v4442_v2 }
 0x425   :  { %4143 = vmatpush3.bf16.msra.mxu0 %v2257_v47  ;;  %4144 = vmatprep.mubr.msk.bf16.mxu0 %vm4454_vm1, %v4453_v1  ;;  %v2303_v40 = vsel %vm2163_vm3, %v1194_v12, 0  ;;  %v1212_v45 = vpack.i.b16 %v1211_v9, %v1210_v6  ;;  %v1222_v7 = vshrl.u32 %v1146_v24, 16  ;;  %v2349_v9 = vsel %vm2163_vm3, %v1197_v34, 0 }
 0x426   :  { %4139 = vmatmul.mubr.msk.bf16.vlgmr.msra.gmra.mrb[40].mxu1 %vm1231_vm2, %v2145_v41  ;;  %4154 = vmatprep.subr.bf16.mxu0 %v4453_v1  ;;  %v1221_v46 = vpack.i.b16 %v1180_v27, %v1146_v24  ;;  %v1182_v52 = vcombine.high %v1180_v27, %v4442_v2  ;;  %v1218_v5 = vpack.i.b16 %v1217_v56, %v1216_v48  ;;  %v1223_v60 = vshrl.u32 %v1180_v27, 16 }
 0x427   :  { %4149 = vmatpush3.bf16.msra.mxu1 %v2303_v40  ;;  %4150 = vmatprep.mubr.msk.bf16.mxu1 %vm4454_vm1, %v4453_v1  ;;  %v1228_v37 = vshrl.u32 %v1148_v58, 16  ;;  %v5148_v29 = vsel %vm2163_vm3, %v1212_v45, 0  ;;  %v2395_v50 = vsel %vm2163_vm3, %v5117_v62, 0 }
 0x428   :  { %4160 = vmatprep.subr.bf16.mxu1 %v4453_v1  ;;  %v5151_v38 = vsel %vm2163_vm3, %v1221_v46, 0  ;;  %v1227_v10 = vpack.i.b16 %v1182_v52, %v1148_v58  ;;  %v1229_v20 = vshrl.u32 %v1182_v52, 16  ;;  %v5154_v2 = vsel %vm2163_vm3, %v1218_v5, 0 }
 0x429   :  { %v1224_v25 = vpack.i.b16 %v1223_v60, %v1222_v7 }
 0x42a   :  { %v5157_v54 = vsel %vm2163_vm3, %v1227_v10, 0  ;;  %v1230_v4 = vpack.i.b16 %v1229_v20, %v1228_v37 }
 0x42b   :  { %v5160_v11 = vsel %vm2163_vm3, %v1224_v25, 0 }
 0x42c   :  { %v5163_v35 = vsel %vm2163_vm3, %v1230_v4, 0 }
 0x431   :  { %v2072_v59 = vpop.xlane.xlu0 %2071 }
 0x432   :  { %4379 = vrcp.f32 %v2072_v59 }
 0x435   :  { %v2078_v57 = vpop.xlane.xlu0 %2077 }
 0x436   :  { %4381 = vrcp.f32 %v2078_v57 }
 0x439   :  { %v2075_v24 = vpop.xlane.xlu1 %2074  ;;  %v2081_v43 = vpop.xlane.xlu0 %2080 }
 0x43a   :  { %4383 = vrcp.f32 %v2075_v24 }
 0x43b   :  { %4385 = vrcp.f32 %v2081_v43 }
 0x43c   :  { %v4380_v19 = vpop.eup %4379 }
 0x43d   :  { %v2084_v12 = vpop.xlane.xlu1 %2083  ;;  %v2117_v41 = vmul.f32 %v4380_v19, %v4974_v17 }
 0x43e   :  { %4387 = vrcp.f32 %v2084_v12 }
 0x43f   :  { %v2146_v47 = vpack.c.bf16 %v2117_v41, %v2117_v41 }
 0x440   :  { %v4382_v6 = vpop.eup %4381 }
 0x441   :  { %4145 = vmatmul.mubr.msk.bf16.vlgmr.msra.gmra.mrb[32].mxu0 %vm1231_vm2, %v2146_v47  ;;  %v2121_v48 = vmul.f32 %v4382_v6, %v4979_v22  ;;  %v2090_v56 = vpop.xlane.xlu1 %2089  ;;  %v2441_v22 = vsel %vm2163_vm3, %v1203_v30, 0 }
 0x442   :  { %4155 = vmatpush3.bf16.msra.mxu0 %v2349_v9  ;;  %4156 = vmatprep.mubr.msk.bf16.mxu0 %vm4454_vm1, %v4453_v1  ;;  %4389 = vrcp.f32 %v2090_v56 }
 0x443   :  { %4166 = vmatprep.subr.bf16.mxu0 %v4453_v1  ;;  %v2148_v45 = vpack.c.bf16 %v2121_v48, %v2121_v48 }
 0x444   :  { %v4384_v27 = vpop.eup %4383 }
 0x445   :  { %v2119_v17 = vmul.f32 %v4384_v27, %v4981_v23  ;;  %v4386_v40 = vpop.eup %4385  ;;  %v2096_v34 = vpop.xlane.xlu1 %2095 }
 0x446   :  { %v2123_v23 = vmul.f32 %v4386_v40, %v4986_v33  ;;  %4391 = vrcp.f32 %v2096_v34  ;;  %v2487_v33 = vsel %vm2163_vm3, %v5125_v42, 0 }
 0x447   :  { %v2147_v58 = vpack.c.bf16 %v2119_v17, %v2119_v17 }
 0x448   :  { %v4388_v46 = vpop.eup %4387  ;;  %v2149_v44 = vpack.c.bf16 %v2123_v23, %v2123_v23 }
 0x449   :  { %4151 = vmatmul.mubr.msk.bf16.vlgmr.msra.gmra.mrb[44].mxu1 %vm1231_vm2, %v2147_v58  ;;  %4157 = vmatmul.mubr.msk.bf16.vlgmr.msra.gmra.mrb[36].mxu0 %vm1231_vm2, %v2148_v45  ;;  %v2125_v16 = vmul.f32 %v4388_v46, %v4990_v63  ;;  %v2533_v63 = vsel %vm2163_vm3, %v1209_v39, 0  ;;  %v2102_v5 = vpop.xlane.xlu1 %2101 }
 0x44a   :  { %4161 = vmatpush3.bf16.msra.mxu1 %v2395_v50  ;;  %4167 = vmatpush3.bf16.msra.mxu0 %v2441_v22 }
 0x44b   :  { %4162 = vmatprep.mubr.msk.bf16.mxu1 %vm4454_vm1, %v4453_v1  ;;  %4168 = vmatprep.mubr.msk.bf16.mxu0 %vm4454_vm1, %v4453_v1  ;;  %v2150_v0 = vpack.c.bf16 %v2125_v16, %v2125_v16 }
 0x44c   :  { %4172 = vmatprep.subr.bf16.mxu1 %v4453_v1  ;;  %4178 = vmatprep.subr.bf16.mxu0 %v4453_v1  ;;  %v4390_v62 = vpop.eup %4389 }
 0x44d   :  { %v2129_v52 = vmul.f32 %v4390_v62, %v4998_v36  ;;  %v2625_v36 = vsel %vm2163_vm3, %v1215_v28, 0  ;;  %v2108_v37 = vpop.xlane.xlu1 %2107 }
 0x44f   :  { %v2152_v31 = vpack.c.bf16 %v2129_v52, %v2129_v52 }
 0x450   :  { %v4392_v8 = vpop.eup %4391 }
 0x451   :  { %v2087_v30 = vpop.xlane.xlu0 %2086  ;;  %4163 = vmatmul.mubr.msk.bf16.vlgmr.msra.gmra.mrb[48].mxu1 %vm1231_vm2, %v2149_v44  ;;  %4169 = vmatmul.mubr.msk.bf16.vlgmr.msra.gmra.mrb[40].mxu0 %vm1231_vm2, %v2150_v0  ;;  %v2133_v60 = vmul.f32 %v4392_v8, %v5003_v21 }
 0x452   :  { %4393 = vrcp.f32 %v2087_v30  ;;  %4173 = vmatpush3.bf16.msra.mxu1 %v2487_v33  ;;  %4179 = vmatpush3.bf16.msra.mxu0 %v2533_v63 }
 0x453   :  { %4180 = vmatprep.mubr.msk.bf16.mxu0 %vm4454_vm1, %v4453_v1  ;;  %4190 = vmatprep.subr.bf16.mxu0 %v4453_v1  ;;  %v2154_v14 = vpack.c.bf16 %v2133_v60, %v2133_v60 }
 0x454   :  { %4174 = vmatprep.mubr.msk.bf16.mxu1 %vm4454_vm1, %v4453_v1  ;;  %4184 = vmatprep.subr.bf16.mxu1 %v4453_v1 }
 0x455   :  { %v2093_v42 = vpop.xlane.xlu0 %2092 }
 0x456   :  { %4395 = vrcp.f32 %v2093_v42 }
 0x457   :  { %4397 = vrcp.f32 %v2102_v5 }
 0x459   :  { %4181 = vmatmul.mubr.msk.bf16.vlgmr.msra.gmra.mrb[44].mxu0 %vm1231_vm2, %v2152_v31  ;;  %v2099_v39 = vpop.xlane.xlu0 %2098 }
 0x45a   :  { %4191 = vmatpush3.bf16.msra.mxu0 %v2625_v36  ;;  %4192 = vmatprep.mubr.msk.bf16.mxu0 %vm4454_vm1, %v4453_v1  ;;  %4399 = vrcp.f32 %v2099_v39 }
 0x45b   :  { %4202 = vmatprep.subr.bf16.mxu0 %v4453_v1  ;;  %4401 = vrcp.f32 %v2108_v37 }
 0x45c   :  { %v4394_v7 = vpop.eup %4393 }
 0x45d   :  { %v2127_v10 = vmul.f32 %v4394_v7, %v5018_v61  ;;  %v2105_v21 = vpop.xlane.xlu0 %2104 }
 0x45e   :  { %4403 = vrcp.f32 %v2105_v21 }
 0x45f   :  { %v2151_v20 = vpack.c.bf16 %v2127_v10, %v2127_v10 }
 0x460   :  { %v4396_v25 = vpop.eup %4395 }
 0x461   :  { %v4398_v26 = vpop.eup %4397  ;;  %4175 = vmatmul.mubr.msk.bf16.vlgmr.msra.gmra.mrb[52].mxu1 %vm1231_vm2, %v2151_v20  ;;  %4193 = vmatmul.mubr.msk.bf16.vlgmr.msra.gmra.mrb[48].mxu0 %vm1231_vm2, %v2154_v14  ;;  %v2131_v28 = vmul.f32 %v4396_v25, %v5023_v15 }
 0x462   :  { %4185 = vmatpush3.bf16.msra.mxu1 %v5148_v29  ;;  %4203 = vmatpush3.bf16.msra.mxu0 %v5151_v38  ;;  %v2137_v61 = vmul.f32 %v4398_v26, %v5008_v32  ;;  %v2111_v38 = vpop.xlane.xlu0 %2110 }
 0x463   :  { %4186 = vmatprep.mubr.msk.bf16.mxu1 %vm4454_vm1, %v4453_v1  ;;  %4196 = vmatprep.subr.bf16.mxu1 %v4453_v1  ;;  %v2153_v29 = vpack.c.bf16 %v2131_v28, %v2131_v28  ;;  %4405 = vrcp.f32 %v2111_v38 }
 0x464   :  { %4204 = vmatprep.mubr.msk.bf16.mxu0 %vm4454_vm1, %v4453_v1  ;;  %4214 = vmatprep.subr.bf16.mxu0 %v4453_v1  ;;  %v4400_v4 = vpop.eup %4399  ;;  %v2156_v59 = vpack.c.bf16 %v2137_v61, %v2137_v61 }
 0x465   :  { %v4402_v15 = vpop.eup %4401  ;;  %v2135_v32 = vmul.f32 %v4400_v4, %v5027_v53 }
 0x466   :  { %v2141_v57 = vmul.f32 %v4402_v15, %v5013_v51 }
 0x468   :  { %v4404_v24 = vpop.eup %4403  ;;  %v2158_v43 = vpack.c.bf16 %v2141_v57, %v2141_v57 }
 0x469   :  { %4187 = vmatmul.mubr.msk.bf16.vlgmr.msra.gmra.mrb[56].mxu1 %vm1231_vm2, %v2153_v29  ;;  %4205 = vmatmul.mubr.msk.bf16.vlgmr.msra.gmra.mrb[52].mxu0 %vm1231_vm2, %v2156_v59  ;;  %v2139_v53 = vmul.f32 %v4404_v24, %v5031_v49 }
 0x46a   :  { %4197 = vmatpush3.bf16.msra.mxu1 %v5154_v2  ;;  %4215 = vmatpush3.bf16.msra.mxu0 %v5157_v54  ;;  %v2155_v2 = vpack.c.bf16 %v2135_v32, %v2135_v32 }
 0x46b   :  { %4198 = vmatprep.mubr.msk.bf16.mxu1 %vm4454_vm1, %v4453_v1  ;;  %4208 = vmatprep.subr.bf16.mxu1 %v4453_v1  ;;  %v2157_v51 = vpack.c.bf16 %v2139_v53, %v2139_v53 }
 0x46c   :  { %4216 = vmatprep.mubr.msk.bf16.mxu0 %vm4454_vm1, %v4453_v1  ;;  %4226 = vmatprep.subr.bf16.mxu0 %v4453_v1 }
 0x46d   :  { %v4406_v54 = vpop.eup %4405 }
 0x471   :  { %4199 = vmatmul.mubr.msk.bf16.vlgmr.msra.gmra.mrb[60].mxu1 %vm1231_vm2, %v2155_v2  ;;  %4217 = vmatmul.mubr.msk.bf16.vlgmr.msra.gmra.mrb[56].mxu0 %vm1231_vm2, %v2158_v43 }
 0x472   :  { %4209 = vmatpush3.bf16.msra.mxu1 %v5160_v11  ;;  %4210 = vmatprep.mubr.msk.bf16.mxu1 %vm4454_vm1, %v4453_v1  ;;  %v2143_v11 = vmul.f32 %v4406_v54, %v5035_v18 }
 0x473   :  { %4220 = vmatprep.subr.bf16.mxu1 %v4453_v1  ;;  %4234 = vmatprep.mubr.msk.bf16.mxu0 %vm4454_vm1, %v4453_v1 }
 0x474   :  { %v2159_v49 = vpack.c.bf16 %v2143_v11, %v2143_v11 }
 0x479   :  { %4211 = vmatmul.mubr.msk.bf16.vlgmr.msra.gmra.mrb[64].mxu1 %vm1231_vm2, %v2157_v51 }
 0x47a   :  { %4221 = vmatpush3.bf16.msra.mxu1 %v5163_v35  ;;  %4222 = vmatprep.mubr.msk.bf16.mxu1 %vm4454_vm1, %v4453_v1 }
 0x47b   :  { %4238 = vmatprep.subr.bf16.mxu1 %v4453_v1 }
 0x481   :  { %4223 = vmatmul.mubr.msk.bf16.vlgmr.msra.gmra.mrb[68].mxu1 %vm1231_vm2, %v2159_v49 }
 0x482   :  { %4246 = vmatprep.mubr.msk.bf16.mxu1 %vm4454_vm1, %v4453_v1 }
 0x4f7   :  { %v2201_v19 = vpop.f32.mrb[28].mxu0 }
 0x4f8   :  { %v4134_v12 = vpop.f32.mrb[29].mxu0 }
 0x4f9   :  { %v2204_v41 = vpop.f32.mrb[30].mxu0  ;;  %v2247_v47 = vpop.f32.mrb[40].mxu1 }
 0x4fa   :  { %v4135_v6 = vpop.f32.mrb[31].mxu0  ;;  %v4140_v9 = vpop.f32.mrb[41].mxu1 }
 0x4fb   :  { %v2250_v35 = vpop.f32.mrb[42].mxu1 }
 0x4fc   :  { %v4141_v27 = vpop.f32.mrb[43].mxu1 }
 0x514   :  { %v2293_v48 = vpop.f32.mrb[32].mxu0 }
 0x515   :  { %v2897_v56 = vcombine.low %v2201_v19, %v2293_v48  ;;  %v2898_v17 = vcombine.high %v2201_v19, %v2293_v48  ;;  %v4146_v18 = vpop.f32.mrb[33].mxu0 }
 0x516   :  { %v2296_v58 = vpop.f32.mrb[34].mxu0 }
 0x517   :  { %v4147_v40 = vpop.f32.mrb[35].mxu0  ;;  %v2905_v44 = vrot.slane %v2897_v56, %v4546_v55  ;;  %v2912_v0 = vrot.slane %v2898_v17, %v4546_v55 }
 0x51c   :  { %v2339_v45 = vpop.f32.mrb[44].mxu1  ;;  %v5259_v22 = vpop.f32.mrb[36].mxu0 }
 0x51d   :  { %v2913_v46 = vcombine.low %v2247_v47, %v2339_v45  ;;  %v2914_v50 = vcombine.high %v2247_v47, %v2339_v45  ;;  %v4152_v23 = vpop.f32.mrb[45].mxu1  ;;  %v4158_v16 = vpop.f32.mrb[37].mxu0 }
 0x51e   :  { %v2342_v34 = vpop.f32.mrb[46].mxu1  ;;  %v2388_v33 = vpop.f32.mrb[38].mxu0 }
 0x51f   :  { %v2921_v62 = vrot.slane %v2913_v46, %v4546_v55  ;;  %v2928_v30 = vrot.slane %v2914_v50, %v4546_v55  ;;  %v4153_v63 = vpop.f32.mrb[47].mxu1  ;;  %v4159_v52 = vpop.f32.mrb[39].mxu0 }
 0x521   :  { %v2961_v5 = vcombine.low %v2905_v44, %v2921_v62  ;;  %v2962_v42 = vcombine.high %v2905_v44, %v2921_v62  ;;  %v2977_v31 = vcombine.low %v2912_v0, %v2928_v30  ;;  %v2978_v8 = vcombine.high %v2912_v0, %v2928_v30 }
 0x523   :  { %v2969_v36 = vrot.slane %v2961_v5, %v4553_v3  ;;  %v2976_v39 = vrot.slane %v2962_v42, %v4553_v3  ;;  %v2985_v7 = vrot.slane %v2977_v31, %v4553_v3  ;;  %v2992_v60 = vrot.slane %v2978_v8, %v4553_v3 }
 0x524   :  { %v2431_v37 = vpop.f32.mrb[48].mxu1  ;;  %v2477_v26 = vpop.f32.mrb[40].mxu0 }
 0x525   :  { %v3924_v10 = vcombine.low %v2969_v36, %v2976_v39  ;;  %v3926_v20 = vcombine.high %v2969_v36, %v2976_v39  ;;  %v3928_v25 = vcombine.low %v2985_v7, %v2992_v60  ;;  %v3930_v14 = vcombine.high %v2985_v7, %v2992_v60  ;;  %v4164_v28 = vpop.f32.mrb[49].mxu1  ;;  %v4170_v29 = vpop.f32.mrb[41].mxu0 }
 0x526   :  { %v2929_v21 = vcombine.low %v5259_v22, %v2477_v26  ;;  %v2930_v61 = vcombine.high %v5259_v22, %v2477_v26  ;;  %v2434_v4 = vpop.f32.mrb[50].mxu1  ;;  %v2480_v57 = vpop.f32.mrb[42].mxu0 }
 0x527   :  { %v3177_v59 = vrot.slane %v3924_v10, %v4546_v55  ;;  %v3193_v15 = vrot.slane %v3926_v20, %v4546_v55  ;;  %v3209_v32 = vrot.slane %v3928_v25, %v4546_v55  ;;  %v3225_v38 = vrot.slane %v3930_v14, %v4546_v55  ;;  %v4165_v2 = vpop.f32.mrb[51].mxu1  ;;  %v4171_v24 = vpop.f32.mrb[43].mxu0 }
 0x528   :  { %v2937_v16 = vrot.slane %v2929_v21, %v4546_v55  ;;  %v2944_v34 = vrot.slane %v2930_v61, %v4546_v55 }
 0x529   :  { %v3234_v43 = vcombine.high %v3177_v59, %v3193_v15  ;;  %v3266_v53 = vcombine.high %v3209_v32, %v3225_v38  ;;  %v3233_v51 = vcombine.low %v3177_v59, %v3193_v15  ;;  %v3265_v54 = vcombine.low %v3209_v32, %v3225_v38 }
 0x52b   :  { %v5276_v11 = vrot.slane %v3234_v43, %v4553_v3  ;;  %v5279_v49 = vrot.slane %v3266_v53, %v4553_v3  ;;  %v5282_v19 = vrot.slane %v3233_v51, %v4553_v3  ;;  %v5285_v12 = vrot.slane %v3265_v54, %v4553_v3 }
 0x52c   :  { %v5287_v41 = vpop.f32.mrb[44].mxu0 }
 0x52d   :  { %v3299_v47 = vcombine.low %v5276_v11, %v5279_v49  ;;  %v3297_v6 = vcombine.low %v5282_v19, %v5285_v12  ;;  %v3298_v9 = vcombine.high %v5282_v19, %v5285_v12  ;;  %v3300_v35 = vcombine.high %v5276_v11, %v5279_v49  ;;  %v4182_v27 = vpop.f32.mrb[45].mxu0 }
 0x52e   :  { %v2572_v48 = vpop.f32.mrb[46].mxu0 }
 0x52f   :  { %v4183_v56 = vpop.f32.mrb[47].mxu0 }
 0x534   :  { %v2523_v17 = vpop.f32.mrb[52].mxu1  ;;  %v2661_v40 = vpop.f32.mrb[48].mxu0 }
 0x535   :  { %v2945_v18 = vcombine.low %v2431_v37, %v2523_v17  ;;  %v2946_v58 = vcombine.high %v2431_v37, %v2523_v17  ;;  %v4176_v45 = vpop.f32.mrb[53].mxu1  ;;  %v3033_v46 = vcombine.low %v5287_v41, %v2661_v40  ;;  %v3034_v50 = vcombine.high %v5287_v41, %v2661_v40  ;;  %v4194_v22 = vpop.f32.mrb[49].mxu0 }
 0x536   :  { %v2526_v23 = vpop.f32.mrb[54].mxu1  ;;  %v2664_v62 = vpop.f32.mrb[50].mxu0 }
 0x537   :  { %v2953_v44 = vrot.slane %v2945_v18, %v4546_v55  ;;  %v2960_v0 = vrot.slane %v2946_v58, %v4546_v55  ;;  %v4177_v30 = vpop.f32.mrb[55].mxu1  ;;  %v4195_v33 = vpop.f32.mrb[51].mxu0 }
 0x539   :  { %v2993_v63 = vcombine.low %v2937_v16, %v2953_v44  ;;  %v2994_v52 = vcombine.high %v2937_v16, %v2953_v44  ;;  %v3009_v5 = vcombine.low %v2944_v34, %v2960_v0  ;;  %v3010_v42 = vcombine.high %v2944_v34, %v2960_v0 }
 0x53a   :  { %v3041_v44 = vrot.slane %v3033_v46, %v4546_v55  ;;  %v3048_v0 = vrot.slane %v3034_v50, %v4546_v55 }
 0x53b   :  { %v3001_v31 = vrot.slane %v2993_v63, %v4553_v3  ;;  %v3008_v8 = vrot.slane %v2994_v52, %v4553_v3  ;;  %v3017_v36 = vrot.slane %v3009_v5, %v4553_v3  ;;  %v3024_v39 = vrot.slane %v3010_v42, %v4553_v3 }
 0x53c   :  { %v2615_v7 = vpop.f32.mrb[56].mxu1  ;;  %v5307_v25 = vpop.f32.mrb[52].mxu0 }
 0x53d   :  { %v3925_v60 = vcombine.low %v3001_v31, %v3008_v8  ;;  %v3927_v37 = vcombine.high %v3001_v31, %v3008_v8  ;;  %v3929_v10 = vcombine.low %v3017_v36, %v3024_v39  ;;  %v3931_v20 = vcombine.high %v3017_v36, %v3024_v39  ;;  %v4188_v14 = vpop.f32.mrb[57].mxu1  ;;  %v4206_v26 = vpop.f32.mrb[53].mxu0 }
 0x53e   :  { %v2618_v28 = vpop.f32.mrb[58].mxu1  ;;  %v2756_v59 = vpop.f32.mrb[54].mxu0 }
 0x53f   :  { %v3184_v21 = vrot.slane %v3925_v60, %v4546_v55  ;;  %v3200_v61 = vrot.slane %v3927_v37, %v4546_v55  ;;  %v3216_v29 = vrot.slane %v3929_v10, %v4546_v55  ;;  %v3232_v4 = vrot.slane %v3931_v20, %v4546_v55  ;;  %v4189_v15 = vpop.f32.mrb[59].mxu1  ;;  %v4207_v32 = vpop.f32.mrb[55].mxu0 }
 0x541   :  { %v3249_v38 = vcombine.low %v3184_v21, %v3200_v61  ;;  %v3281_v57 = vcombine.low %v3216_v29, %v3232_v4  ;;  %v3250_v2 = vcombine.high %v3184_v21, %v3200_v61  ;;  %v3282_v24 = vcombine.high %v3216_v29, %v3232_v4 }
 0x543   :  { %v5314_v43 = vrot.slane %v3249_v38, %v4553_v3  ;;  %v5317_v53 = vrot.slane %v3281_v57, %v4553_v3  ;;  %v5320_v51 = vrot.slane %v3250_v2, %v4553_v3  ;;  %v5323_v54 = vrot.slane %v3282_v24, %v4553_v3 }
 0x544   :  { %v2707_v41 = vpop.f32.mrb[60].mxu1  ;;  %v2845_v56 = vpop.f32.mrb[56].mxu0 }
 0x545   :  { %v3049_v27 = vcombine.low %v2615_v7, %v2707_v41  ;;  %v3050_v48 = vcombine.high %v2615_v7, %v2707_v41  ;;  %v4200_v17 = vpop.f32.mrb[61].mxu1  ;;  %v3302_v18 = vcombine.high %v5314_v43, %v5317_v53  ;;  %v3301_v58 = vcombine.low %v5314_v43, %v5317_v53  ;;  %v4218_v22 = vpop.f32.mrb[57].mxu0  ;;  %v4331_v41 = vld [vmem:[%s5506_s2] sm:$0xff]  }
 0x546   :  { %v3065_v40 = vcombine.low %v5307_v25, %v2845_v56  ;;  %v3066_v45 = vcombine.high %v5307_v25, %v2845_v56  ;;  %v2710_v23 = vpop.f32.mrb[62].mxu1  ;;  %v3304_v16 = vcombine.high %v5320_v51, %v5323_v54  ;;  %v3303_v34 = vcombine.low %v5320_v51, %v5323_v54  ;;  %v2848_v33 = vpop.f32.mrb[58].mxu0  ;;  %4227 = vmatpush3.bf16.msra.mxu0 %v4331_v41 }
 0x547   :  { %v3057_v62 = vrot.slane %v3049_v27, %v4546_v55  ;;  %v3064_v30 = vrot.slane %v3050_v48, %v4546_v55  ;;  %v4201_v63 = vpop.f32.mrb[63].mxu1  ;;  %v4219_v52 = vpop.f32.mrb[59].mxu0  ;;  %4228 = vmatprep.subr.bf16.mxu0 %v4453_v1 }
 0x548   :  { %v4332_v63 = vld [vmem:[%s5506_s2 + $0x8] sm:$0xff]  }
 0x549   :  { %v3097_v5 = vcombine.low %v3041_v44, %v3057_v62  ;;  %v3098_v42 = vcombine.high %v3041_v44, %v3057_v62  ;;  %v3113_v31 = vcombine.low %v3048_v0, %v3064_v30  ;;  %v3114_v8 = vcombine.high %v3048_v0, %v3064_v30 }
 0x54a   :  { %v3073_v44 = vrot.slane %v3065_v40, %v4546_v55  ;;  %v3080_v0 = vrot.slane %v3066_v45, %v4546_v55  ;;  %4229 = vmatpush3.bf16.msra.mxu0 %v4332_v63 }
 0x54b   :  { %v3105_v36 = vrot.slane %v3097_v5, %v4553_v3  ;;  %v3112_v39 = vrot.slane %v3098_v42, %v4553_v3  ;;  %v3121_v7 = vrot.slane %v3113_v31, %v4553_v3  ;;  %v3128_v46 = vrot.slane %v3114_v8, %v4553_v3  ;;  %4230 = vmatprep.subr.bf16.mxu0 %v4453_v1 }
 0x54c   :  { %v2799_v50 = vpop.f32.mrb[64].mxu1 }
 0x54d   :  { %v3932_v60 = vcombine.low %v3105_v36, %v3112_v39  ;;  %v3934_v37 = vcombine.high %v3105_v36, %v3112_v39  ;;  %v3936_v10 = vcombine.low %v3121_v7, %v3128_v46  ;;  %v3938_v20 = vcombine.high %v3121_v7, %v3128_v46  ;;  %v4212_v25 = vpop.f32.mrb[65].mxu1 }
 0x54e   :  { %v2802_v14 = vpop.f32.mrb[66].mxu1 }
 0x54f   :  { %v3313_v26 = vrot.slane %v3932_v60, %v4546_v55  ;;  %v3329_v28 = vrot.slane %v3934_v37, %v4546_v55  ;;  %v3345_v21 = vrot.slane %v3936_v10, %v4546_v55  ;;  %v3361_v61 = vrot.slane %v3938_v20, %v4546_v55  ;;  %v4213_v29 = vpop.f32.mrb[67].mxu1  ;;  %v4333_v37 = vld [vmem:[%s5506_s2 + $0x10] sm:$0xff]  }
 0x550   :  { %4231 = vmatpush3.bf16.msra.mxu0 %v4333_v37 }
 0x551   :  { %v3370_v4 = vcombine.high %v3313_v26, %v3329_v28  ;;  %v3402_v59 = vcombine.high %v3345_v21, %v3361_v61  ;;  %v3369_v15 = vcombine.low %v3313_v26, %v3329_v28  ;;  %v3401_v32 = vcombine.low %v3345_v21, %v3361_v61  ;;  %4232 = vmatprep.subr.bf16.mxu0 %v4453_v1 }
 0x553   :  { %v3384_v38 = vrot.slane %v3370_v4, %v4553_v3  ;;  %v3416_v57 = vrot.slane %v3402_v59, %v4553_v3  ;;  %v5350_v2 = vrot.slane %v3369_v15, %v4553_v3  ;;  %v5353_v24 = vrot.slane %v3401_v32, %v4553_v3  ;;  %v4334_v32 = vld [vmem:[%s5506_s2 + $0x18] sm:$0xff]  }
 0x554   :  { %v2891_v27 = vpop.f32.mrb[68].mxu1  ;;  %4233 = vmatpush3.bf16.msra.mxu0 %v4334_v32 }
 0x555   :  { %v3081_v48 = vcombine.low %v2799_v50, %v2891_v27  ;;  %v3082_v56 = vcombine.high %v2799_v50, %v2891_v27  ;;  %v4224_v17 = vpop.f32.mrb[69].mxu1  ;;  %v3435_v22 = vcombine.low %v3384_v38, %v3416_v57  ;;  %v3434_v23 = vcombine.high %v5350_v2, %v5353_v24  ;;  %4250 = vmatprep.subr.bf16.mxu0 %v4453_v1 }
 0x556   :  { %v2894_v62 = vpop.f32.mrb[70].mxu1  ;;  %v3433_v30 = vcombine.low %v5350_v2, %v5353_v24  ;;  %v3436_v33 = vcombine.high %v3384_v38, %v3416_v57 }
 0x557   :  { %v3089_v52 = vrot.slane %v3081_v48, %v4546_v55  ;;  %v3096_v5 = vrot.slane %v3082_v56, %v4546_v55  ;;  %v4225_v42 = vpop.f32.mrb[71].mxu1  ;;  %v4289_v40 = vpack.i.bf16 %v3435_v22, %v3299_v47  ;;  %v4284_v45 = vpack.i.bf16 %v3434_v23, %v3298_v9 }
 0x558   :  { %v4294_v31 = vpack.i.bf16 %v3436_v33, %v3300_v35 }
 0x559   :  { %v3129_v8 = vcombine.low %v3073_v44, %v3089_v52  ;;  %v3130_v36 = vcombine.high %v3073_v44, %v3089_v52  ;;  %v3145_v39 = vcombine.low %v3080_v0, %v3096_v5  ;;  %v3146_v7 = vcombine.high %v3080_v0, %v3096_v5  ;;  %4290 = vrot.lane.b32.xlu0 %v4289_v40, %s4455_s24 }
 0x55a   :  { %4285 = vrot.lane.b32.xlu1 %v4284_v45, %s4456_s25 }
 0x55b   :  { %v3137_v47 = vrot.slane %v3129_v8, %v4553_v3  ;;  %v3144_v46 = vrot.slane %v3130_v36, %v4553_v3  ;;  %v3153_v9 = vrot.slane %v3145_v39, %v4553_v3  ;;  %v3160_v50 = vrot.slane %v3146_v7, %v4553_v3 }
 0x55d   :  { %v3933_v11 = vcombine.low %v3137_v47, %v3144_v46  ;;  %v3935_v49 = vcombine.high %v3137_v47, %v3144_v46  ;;  %v3937_v35 = vcombine.low %v3153_v9, %v3160_v50  ;;  %v3939_v60 = vcombine.high %v3153_v9, %v3160_v50 }
 0x55e   :  { %4295 = vrot.lane.b32.xlu1 %v4294_v31, %s4457_s26 }
 0x55f   :  { %v3320_v10 = vrot.slane %v3933_v11, %v4546_v55  ;;  %v3336_v20 = vrot.slane %v3935_v49, %v4546_v55  ;;  %v3352_v25 = vrot.slane %v3937_v35, %v4546_v55  ;;  %v3368_v14 = vrot.slane %v3939_v60, %v4546_v55  ;;  %v5428_v49 = vld [vmem:[%s5507_s3] sm:$0xff] }
 0x560   :  { %v3528_v11 = vsub.s32 1, %v4521_v13 }
 0x561   :  { %v3385_v26 = vcombine.low %v3320_v10, %v3336_v20  ;;  %v3417_v28 = vcombine.low %v3352_v25, %v3368_v14  ;;  %v3386_v21 = vcombine.high %v3320_v10, %v3336_v20  ;;  %v3418_v61 = vcombine.high %v3352_v25, %v3368_v14  ;;  %v4416_v25 = vld [vmem:[%s5504_s0] sm:$0xff] }
 0x562   :  { %v3529_v35 = vrot.slane %v5428_v49, %v3528_v11 }
 0x563   :  { %v3393_v29 = vrot.slane %v3385_v26, %v4553_v3  ;;  %v3425_v4 = vrot.slane %v3417_v28, %v4553_v3  ;;  %v3400_v59 = vrot.slane %v3386_v21, %v4553_v3  ;;  %v3432_v15 = vrot.slane %v3418_v61, %v4553_v3  ;;  %v4417_v21 = vld [vmem:[%s5504_s0 + $0x8] sm:$0xff] }
 0x565   :  { %v3438_v55 = vcombine.high %v3393_v29, %v3425_v4  ;;  %v3437_v38 = vcombine.low %v3393_v29, %v3425_v4  ;;  %v3440_v57 = vcombine.high %v3400_v59, %v3432_v15  ;;  %v3439_v41 = vcombine.low %v3400_v59, %v3432_v15 }
 0x567   :  { %v4304_v27 = vpack.i.bf16 %v3438_v55, %v3302_v18  ;;  %v4299_v48 = vpack.i.bf16 %v3437_v38, %v3301_v58  ;;  %v4314_v3 = vpack.i.bf16 %v3440_v57, %v3304_v16  ;;  %v4309_v56 = vpack.i.bf16 %v3439_v41, %v3303_v34  ;;  %v4335_v38 = vld [vmem:[%s5506_s2 + $0x20] sm:$0xff]   ;;  %v4336_v57 = vld [vmem:[%s5506_s2 + $0x28] sm:$0xff]   ;;  %v4337_v41 = vld [vmem:[%s5506_s2 + $0x30] sm:$0xff]  }
 0x568   :  { %4239 = vmatpush3.bf16.msra.mxu1 %v4335_v38 }
 0x569   :  { %4305 = vrot.lane.b32.xlu0 %v4304_v27, %s4458_s5  ;;  %4300 = vrot.lane.b32.xlu1 %v4299_v48, %s4459_s6  ;;  %v4339_v27 = vld [vmem:[%s5506_s2 + $0x40] sm:$0xff]   ;;  %v4338_v48 = vld [vmem:[%s5506_s2 + $0x38] sm:$0xff]  }
 0x56a   :  { %4240 = vmatprep.subr.bf16.mxu1 %v4453_v1 }
 0x56c   :  { %4241 = vmatpush3.bf16.msra.mxu1 %v4336_v57 }
 0x56d   :  { %4315 = vrot.lane.b32.xlu0 %v4314_v3, %s4460_s7  ;;  %4310 = vrot.lane.b32.xlu1 %v4309_v56, %s4461_s8 }
 0x56e   :  { %4242 = vmatprep.subr.bf16.mxu1 %v4453_v1 }
 0x570   :  { %4243 = vmatpush3.bf16.msra.mxu1 %v4337_v41 }
 0x571   :  { %4244 = vmatprep.subr.bf16.mxu1 %v4453_v1 }
 0x574   :  { %4245 = vmatpush3.bf16.msra.mxu1 %v4338_v48 }
 0x5cb   :  { %v4291_v53 = vpop.permute.xlu0 %4290 }
 0x5cc   :  { %v4286_v43 = vpop.permute.xlu1 %4285  ;;  %v4293_v16 = vunpack.i.h.bf16 %v4291_v53  ;;  %v4292_v22 = vunpack.i.l.bf16 %v4291_v53 }
 0x5cd   :  { %v4288_v18 = vunpack.i.h.bf16 %v4286_v43  ;;  %v4287_v58 = vunpack.i.l.bf16 %v4286_v43 }
 0x5cf   :  { %v3497_v51 = vsel %vm1231_vm2, %v3297_v6, %v4287_v58  ;;  %v3498_v54 = vsel %vm1231_vm2, %v3433_v30, %v4288_v18 }
 0x5d0   :  { %v4296_v17 = vpop.permute.xlu1 %4295  ;;  %v3500_v62 = vsel %vm3499_vm4, %v3497_v51, %v4292_v22  ;;  %v3501_v33 = vsel %vm3499_vm4, %v3498_v54, %v4293_v16 }
 0x5d1   :  { %v4298_v34 = vunpack.i.h.bf16 %v4296_v17  ;;  %v4297_v23 = vunpack.i.l.bf16 %v4296_v17 }
 0x5d3   :  { %v3503_v5 = vsel %vm3502_vm5, %v3500_v62, %v4297_v23  ;;  %v3504_v42 = vsel %vm3502_vm5, %v3501_v33, %v4298_v34 }
 0x5db   :  { %v4306_v44 = vpop.permute.xlu0 %4305  ;;  %v4301_v0 = vpop.permute.xlu1 %4300 }
 0x5dc   :  { %v4303_v63 = vunpack.i.h.bf16 %v4301_v0  ;;  %v4302_v52 = vunpack.i.l.bf16 %v4301_v0  ;;  %v4308_v19 = vunpack.i.h.bf16 %v4306_v44  ;;  %v4307_v12 = vunpack.i.l.bf16 %v4306_v44 }
 0x5dd   :  { %v3633_v0 = vsub.s32 2, %v4521_v13 }
 0x5de   :  { %v3507_v6 = vsel %vm3505_vm6, %v3504_v42, %v4303_v63  ;;  %v3506_v40 = vsel %vm3505_vm6, %v3503_v5, %v4302_v52  ;;  %v3639_v63 = vsub.s32 3, %v4521_v13 }
 0x5df   :  { %v4316_v2 = vpop.permute.xlu0 %4315  ;;  %v4311_v24 = vpop.permute.xlu1 %4310  ;;  %v3509_v36 = vsel %vm3508_vm7, %v3506_v40, %v4307_v12  ;;  %v3510_v39 = vsel %vm3508_vm7, %v3507_v6, %v4308_v19  ;;  %v3634_v33 = vrot.slane %v5428_v49, %v3633_v0  ;;  %v3849_v0 = vsub.s32 7, %v4521_v13 }
 0x5e0   :  { %v4318_v30 = vunpack.i.h.bf16 %v4316_v2  ;;  %v4317_v45 = vunpack.i.l.bf16 %v4316_v2  ;;  %v4313_v31 = vunpack.i.h.bf16 %v4311_v24  ;;  %v4312_v8 = vunpack.i.l.bf16 %v4311_v24 }
 0x5e1   :  { %v3640_v40 = vrot.slane %v5428_v49, %v3639_v63 }
 0x5e2   :  { %v3512_v7 = vsel %vm3511_vm8, %v3509_v36, %v4312_v8  ;;  %v3513_v47 = vsel %vm3511_vm8, %v3510_v39, %v4313_v31  ;;  %v4340_v31 = vld [vmem:[%s5506_s2 + $0x48] sm:$0xff]   ;;  %v4341_v8 = vld [vmem:[%s5506_s2 + $0x50] sm:$0xff]   ;;  %v4342_v36 = vld [vmem:[%s5506_s2 + $0x58] sm:$0xff]   ;;  %v3654_v39 = vsub.s32 4, %v4521_v13  ;;  %s4462_s2 = smov [#allocation2]  }
 0x5e3   :  { %v3515_v46 = vsel %vm3514_vm9, %v3512_v7, %v4317_v45  ;;  %v3516_v9 = vsel %vm3514_vm9, %v3513_v47, %v4318_v30  ;;  %s3860_s29 = sshll.u32 %s4462_s2, 4  ;;  %s3861_s29 = int_to_ptr.vmem [resolvable:$true] %s3860_s29 }
 0x5e4   :  { %v3517_v50 = vpack.c.bf16 %v3516_v9, %v3515_v46  ;;  %v3655_v7 = vrot.slane %v5428_v49, %v3654_v39  ;;  %s4418_s30 = scalar_lea.vmem %s3861_s29, 256  ;;  %p4423_p1 = scmp.lt.s32.totalorder %s3861_s29, %s3861_s29 }
 0x5e5   :  { %p4419_p0 = scmp.ne.s32.totalorder %s3861_s29, %s4418_s30  ;;  %p4424_p2 = scmp.lt.s32.totalorder %s4418_s30, %s4418_s30 }
 0x5e6   :  { %4235 = vmatmul.mubr.msk.bf16.vlgmr.msra.gmra.mrb[60].mxu0 %vm80_vm0, %v3517_v50 }
 0x5e7   :  { %4258 = vmatprep.mubr.msk.bf16.mxu0 %vm4454_vm1, %v4453_v1  ;;  %4251 = vmatpush3.bf16.msra.mxu0 %v4339_v27  ;;  %p4425_p3 = por %p4424_p2, %p4423_p1 }
 0x5e8   :  { %4252 = vmatprep.subr.bf16.mxu0 %v4453_v1 }
 0x5e9   :  { %p4426_p4 = pnand %p4425_p3, %p4419_p0 }
 0x5eb   :  { %4253 = vmatpush3.bf16.msra.mxu0 %v4340_v31 }
 0x5ec   :  { %4254 = vmatprep.subr.bf16.mxu0 %v4453_v1 }
 0x5ef   :  { %4255 = vmatpush3.bf16.msra.mxu0 %v4341_v8 }
 0x5f0   :  { %4256 = vmatprep.subr.bf16.mxu0 %v4453_v1  ;;  %v3739_v1 = vsub.s32 5, %v4521_v13 }
 0x5f3   :  { %4257 = vmatpush3.bf16.msra.mxu0 %v4342_v36 }
 0x6b9   :  { %v3591_v60 = vpop.f32.mrb[60].mxu0 }
 0x6ba   :  { %v3592_v37 = vadd.f32 %v3591_v60, %v3529_v35  ;;  %v4236_v10 = vpop.f32.mrb[61].mxu0 }
 0x6bb   :  { %v3594_v20 = vpop.f32.mrb[62].mxu0 }
 0x6bc   :  { %v3598_v14 = vadd.f32 %v4416_v25, %v3592_v37  ;;  %v3595_v26 = vadd.f32 %v3594_v20, %v3529_v35  ;;  %v4237_v28 = vpop.f32.mrb[63].mxu0 }
 0x6be   :  { %v3599_v61 = vadd.f32 %v4417_v21, %v3595_v26  ;;  %v3600_v29 = vsel %vm80_vm0, %v3598_v14, 0.0  ;;  %v3609_v15 = vmul.f32 %v3598_v14, %v3598_v14 }
 0x6bf   :  { %3601 = vadd.xlane.f32.xlu1 %v3600_v29 }
 0x6c0   :  { %v3603_v4 = vsel %vm80_vm0, %v3599_v61, 0.0  ;;  %v3610_v59 = vmul.f32 %v3599_v61, %v3599_v61  ;;  %v3611_v55 = vsel %vm80_vm0, %v3609_v15, 0.0 }
 0x6c1   :  { %3604 = vadd.xlane.f32.xlu0 %v3603_v4 }
 0x6c2   :  { %v3614_v32 = vsel %vm80_vm0, %v3610_v59, 0.0 }
 0x6c3   :  { %3615 = vadd.xlane.f32.xlu1 %v3614_v32 }
 0x6c5   :  { %3612 = vadd.xlane.f32.xlu0 %v3611_v55 }
 0x74c   :  { %v3602_v3 = vpop.xlane.xlu1 %3601 }
 0x74d   :  { %v3607_v43 = vmul.f32 0.015625, %v3602_v3 }
 0x74e   :  { %v3605_v56 = vpop.xlane.xlu0 %3604 }
 0x74f   :  { %v3608_v53 = vmul.f32 0.015625, %v3605_v56  ;;  %v3619_v22 = vmul.f32 %v3607_v43, %v3607_v43  ;;  %v3623_v5 = vsub.f32 %v3598_v14, %v3607_v43  ;;  %v3740_v14 = vrot.slane %v5428_v49, %v3739_v1 }
 0x750   :  { %v3616_v18 = vpop.xlane.xlu1 %3615 }
 0x751   :  { %v3620_v58 = vmul.f32 %v3608_v53, %v3608_v53  ;;  %v3618_v17 = vmul.f32 0.015625, %v3616_v18  ;;  %v3624_v62 = vsub.f32 %v3599_v61, %v3608_v53 }
 0x752   :  { %v3613_v16 = vpop.xlane.xlu0 %3612 }
 0x753   :  { %v3622_v51 = vsub.f32 %v3618_v17, %v3620_v58  ;;  %v3617_v54 = vmul.f32 0.015625, %v3613_v16 }
 0x755   :  { %v3626_v34 = vadd.f32 1e-05, %v3622_v51  ;;  %v3621_v23 = vsub.f32 %v3617_v54, %v3619_v22 }
 0x757   :  { %4407 = vrsqrt.f32 %v3626_v34  ;;  %v3625_v44 = vadd.f32 1e-05, %v3621_v23 }
 0x759   :  { %4409 = vrsqrt.f32 %v3625_v44  ;;  %v3843_v44 = vsub.s32 6, %v4521_v13 }
 0x761   :  { %v4408_v52 = vpop.eup %4407 }
 0x762   :  { %v3630_v42 = vmul.f32 %v4408_v52, %v3624_v62 }
 0x763   :  { %v4410_v19 = vpop.eup %4409 }
 0x764   :  { %v3629_v12 = vmul.f32 %v4410_v19, %v3623_v5  ;;  %v3636_v6 = vmul.f32 %v3634_v33, %v3630_v42  ;;  %v3850_v42 = vrot.slane %v5428_v49, %v3849_v0 }
 0x766   :  { %v3635_v2 = vmul.f32 %v3634_v33, %v3629_v12  ;;  %v3642_v30 = vadd.f32 %v3640_v40, %v3636_v6  ;;  %v3844_v33 = vrot.slane %v5428_v49, %v3843_v44 }
 0x768   :  { %v3641_v24 = vadd.f32 %v3640_v40, %v3635_v2 }
 0x76a   :  { %v3643_v45 = vpack.c.bf16 %v3642_v30, %v3641_v24 }
 0x76c   :  { %4247 = vmatmul.mubr.msk.bf16.vlgmr.msra.gmra.mrb[72].mxu1 %vm80_vm0, %v3643_v45 }
 0x83f   :  { %v3717_v47 = vpop.f32.mrb[72].mxu1 }
 0x840   :  { %v3718_v46 = vadd.f32 %v3717_v47, %v3655_v7  ;;  %v4248_v9 = vpop.f32.mrb[73].mxu1 }
 0x841   :  { %v3720_v50 = vpop.f32.mrb[74].mxu1 }
 0x842   :  { %v3724_v11 = vmul.f32 0.01, %v3718_v46  ;;  %v3721_v35 = vadd.f32 %v3720_v50, %v3655_v7  ;;  %v4249_v60 = vpop.f32.mrb[75].mxu1 }
 0x844   :  { %v3725_v37 = vmul.f32 0.01, %v3721_v35  ;;  %v3726_v10 = vmax.f32 %v3718_v46, %v3724_v11 }
 0x846   :  { %v3727_v20 = vmax.f32 %v3721_v35, %v3725_v37 }
 0x848   :  { %v3728_v25 = vpack.c.bf16 %v3727_v20, %v3726_v10 }
 0x84a   :  { %4259 = vmatmul.mubr.msk.bf16.vlgmr.msra.gmra.mrb[64].mxu0 %vm80_vm0, %v3728_v25 }
 0x91d   :  { %v3802_v26 = vpop.f32.mrb[64].mxu0 }
 0x91e   :  { %v3803_v28 = vadd.f32 %v3802_v26, %v3740_v14  ;;  %v4260_v21 = vpop.f32.mrb[65].mxu0 }
 0x91f   :  { %v3805_v61 = vpop.f32.mrb[66].mxu0 }
 0x920   :  { %v3809_v29 = vadd.f32 %v3803_v28, %v3641_v24  ;;  %v3806_v4 = vadd.f32 %v3805_v61, %v3740_v14  ;;  %v4261_v59 = vpop.f32.mrb[67].mxu0 }
 0x922   :  { %v3810_v15 = vadd.f32 %v3806_v4, %v3642_v30  ;;  %v3811_v32 = vsel %vm80_vm0, %v3809_v29, 0.0  ;;  %v3819_v55 = vmul.f32 %v3809_v29, %v3809_v29 }
 0x923   :  { %3812 = vadd.xlane.f32.xlu0 %v3811_v32 }
 0x924   :  { %v3814_v38 = vsel %vm80_vm0, %v3810_v15, 0.0  ;;  %v3820_v57 = vmul.f32 %v3810_v15, %v3810_v15  ;;  %v3821_v41 = vsel %vm80_vm0, %v3819_v55, 0.0 }
 0x925   :  { %3815 = vadd.xlane.f32.xlu1 %v3814_v38 }
 0x926   :  { %v3824_v27 = vsel %vm80_vm0, %v3820_v57, 0.0 }
 0x927   :  { %3822 = vadd.xlane.f32.xlu0 %v3821_v41 }
 0x929   :  { %3825 = vadd.xlane.f32.xlu1 %v3824_v27 }
 0x9b0   :  { %v3813_v48 = vpop.xlane.xlu0 %3812 }
 0x9b1   :  { %v3817_v3 = vmul.f32 0.015625, %v3813_v48 }
 0x9b2   :  { %v3816_v56 = vpop.xlane.xlu1 %3815 }
 0x9b3   :  { %v3818_v43 = vmul.f32 0.015625, %v3816_v56  ;;  %v3829_v18 = vmul.f32 %v3817_v3, %v3817_v3  ;;  %v3833_v62 = vsub.f32 %v3809_v29, %v3817_v3 }
 0x9b4   :  { %v3823_v53 = vpop.xlane.xlu0 %3822 }
 0x9b5   :  { %v3827_v58 = vmul.f32 0.015625, %v3823_v53  ;;  %v3830_v16 = vmul.f32 %v3818_v43, %v3818_v43  ;;  %v3834_v52 = vsub.f32 %v3810_v15, %v3818_v43 }
 0x9b6   :  { %v3826_v17 = vpop.xlane.xlu1 %3825 }
 0x9b7   :  { %v3831_v22 = vsub.f32 %v3827_v58, %v3829_v18  ;;  %v3828_v51 = vmul.f32 0.015625, %v3826_v17 }
 0x9b9   :  { %v3835_v54 = vadd.f32 1e-05, %v3831_v22  ;;  %v3832_v34 = vsub.f32 %v3828_v51, %v3830_v16 }
 0x9bb   :  { %4411 = vrsqrt.f32 %v3835_v54  ;;  %v3836_v23 = vadd.f32 1e-05, %v3832_v34 }
 0x9bd   :  { %4413 = vrsqrt.f32 %v3836_v23 }
 0x9c5   :  { %v4412_v63 = vpop.eup %4411 }
 0x9c6   :  { %v3839_v5 = vmul.f32 %v4412_v63, %v3833_v62 }
 0x9c7   :  { %v4414_v19 = vpop.eup %4413 }
 0x9c8   :  { %v3840_v12 = vmul.f32 %v4414_v19, %v3834_v52  ;;  %v3845_v6 = vmul.f32 %v3844_v33, %v3839_v5 }
 0x9ca   :  { %v3846_v40 = vmul.f32 %v3844_v33, %v3840_v12  ;;  %v3851_v2 = vadd.f32 %v3850_v42, %v3845_v6 }
 0x9cc   :  { %v3852_v24 = vadd.f32 %v3850_v42, %v3846_v40  ;;  %3853 = vst.msk [vmem:[#allocation2] sm:$0xff] %vm80_vm0, %v3851_v2 }
 0x9ce   :  { %3854 = vst.msk [vmem:[#allocation2 + $0x8] sm:$0xff] %vm80_vm0, %v3852_v24 }
 0x9cf   :  { %4429 = shalt.err (!%p4426_p4)
}
 0x9d0   :  { %s4430_s7 = scalar_lea.hbm %s5508_s4, 256 }
 0x9d1   :  { %p4431_p5 = scmp.ne.s32.totalorder %s5508_s4, %s4430_s7  ;;  %p4434_p6 = scmp.lt.u32.totalorder %s4430_s7, %s5508_s4 }
 0x9d3   :  { %p4436_p7 = pnand %p4434_p6, %p4431_p5 }
 0x9d5   :  { %4439 = shalt.err (!%p4436_p7)
}
 0x9d6   :  { %s4463_s11 = smov 128  }
 0x9d7   :  { %3866 = dma.vmem_to_hbm [thread:$0]  %s3861_s29, 256, %s5508_s4, [#allocation3], %s4463_s11, %s4463_s11, %s4456_s25  }
 0x9d8   :  { %4440 = dma.done.wait [#allocation3], 256  }
 0x9d9   :  { %4441 = vsyncadd [#allocation3], 4294967040 }
 0x9da   :  { %3870 = vsyncpa [#allocation3], 1 }

</bundles_post_ra>
